<compile_context>
chip_gen: v6e
topology: v6e:2x2x1
jax: 0.10.0
libtpu: 0.0.40
codegen_flags: <defaults>
</compile_context>

<pallas_src>
import functools

import numpy as np
import jax
import jax.numpy as jnp
from jax.experimental import pallas as pl
from jax.experimental.pallas import tpu as pltpu

EPS = 1e-5
KSIZE = 4     # ConvTranspose2d kernel size
NPHASE = 4    # 2x2 output parities for stride-2 upsampling
NTAPS = 4     # taps contributing to each output parity (k=4, s=2, p=1)

# output row 2*i+ph gets contributions from (padded-input row shift, kh):
#   ph=0: (1, kh=1), (0, kh=3)     ph=1: (1, kh=2), (2, kh=0)
_TAP_CFG = {0: ((1, 1), (0, 3)), 1: ((1, 2), (2, 0))}


# ---------------------------------------------------------------------------
# kernels
# ---------------------------------------------------------------------------
def conv_stats_kernel(xv_ref, w_ref, y_ref, stats_ref, *, view_idx):
    """Phase-decomposed ConvTranspose2d tile + running InstanceNorm stats.

    xv_ref    : (1, 9, hw_t, Cin)       bf16  -- 9 deduplicated shifted views
    w_ref     : (4, 4, Cin, Cout_p)     bf16  -- [phase, tap, Cin, Cout_p]
    y_ref     : (1, 4, hw_t, Cout_p)    bf16  -- raw conv output tile
    stats_ref : (1, 1, 2, Cout_p)       f32   -- [sum, sum_sq] partials,
                accumulated across the inner ("arbitrary") HW-tile axis.
    """
    t = pl.program_id(2)

    psum = None
    psq = None
    for p in range(NPHASE):     # unrolled: 4 accumulating K=Cin MXU dots each
        acc = jnp.dot(xv_ref[0, view_idx[p][0]], w_ref[p, 0],
                      preferred_element_type=jnp.float32)
        for tap in range(1, NTAPS):
            acc = acc + jnp.dot(xv_ref[0, view_idx[p][tap]], w_ref[p, tap],
                                preferred_element_type=jnp.float32)
        # stats from the f32 accumulator, then down-cast the stored tile.
        y_ref[0, p] = acc.astype(y_ref.dtype)
        s = jnp.sum(acc, axis=0, keepdims=True)
        sq = jnp.sum(acc * acc, axis=0, keepdims=True)
        psum = s if psum is None else psum + s
        psq = sq if psq is None else psq + sq
    part = jnp.concatenate([psum, psq], axis=0)          # (2, Cout_p)

    @pl.when(t == 0)
    def _init():
        stats_ref[0, 0] = part

    @pl.when(t > 0)
    def _acc():
        stats_ref[0, 0] = stats_ref[0, 0] + part


def norm_relu_kernel(y_ref, stats_ref, out_ref, *, inv_count):
    """InstanceNorm + ReLU + depth-to-space store on one row-aligned tile.

    y_ref     : (1, 4, hw_t, Cout_p)         bf16
    stats_ref : (1, hw_split, 2, Cout_p)     f32  (per-split partial sums)
    out_ref   : (1, rows_t, 2, W, 2*Cout_p)  f32  -- [., i, ph, j, pw*C + c]
    """
    rows = out_ref.shape[1]
    w = out_ref.shape[3]
    cp = out_ref.shape[4] // 2

    s = jnp.sum(stats_ref[0], axis=0)                    # (2, Cout_p)
    mean = s[0:1, :] * inv_count                         # (1, Cout_p)
    ex2 = s[1:2, :] * inv_count
    # one-pass variance (clamped).
    # TODO(synk): mean-centered / two-pass stats would be more robust when
    # |mean| >> std at very large spatial extents.
    var = jnp.maximum(ex2 - mean * mean, 0.0)
    inv_std = jax.lax.rsqrt(var + EPS)                   # (1, Cout_p)
    shift = mean * inv_std

    yf = y_ref[0].astype(jnp.float32)                    # (4, hw_t, Cout_p)
    yn = jnp.maximum(yf * inv_std - shift, 0.0)          # norm + ReLU, one pass
    # Dropout(p=0.0) is the identity.
    # TODO(synk): non-zero dropout would use pltpu.prng_seed/prng_random_bits.

    for ph in range(2):                                  # depth-to-space fold
        for pw in range(2):
            p = 2 * ph + pw
            out_ref[0, :, ph, :, pw * cp:(pw + 1) * cp] = (
                yn[p].reshape(rows, w, cp))


# ---------------------------------------------------------------------------
# VMEM budgeting / tile selection
# ---------------------------------------------------------------------------
def _ceil_to(x, m):
    return (int(x) + m - 1) // m * m


def _block_vmem_bytes(shape, dtype):
    """Approx. VMEM footprint of one buffer of a block (tiled minor dims)."""
    isz = jnp.dtype(dtype).itemsize
    sublane = {4: 8, 2: 16, 1: 32}.get(isz, 8)
    lead = 1
    for d in shape[:-2]:
        lead *= int(d)
    return lead * _ceil_to(shape[-2], sublane) * _ceil_to(shape[-1], 128) * isz


def _vmem_budget_bytes():
    """Chip-aware usable VMEM (physical capacity minus headroom)."""
    try:
        phys = int(pltpu.get_tpu_info().vmem_capacity_bytes)
    except Exception:
        phys = 64 * 1024 * 1024        # conservative fallback (safe on v7x)
    return int(phys * 0.82)


def _estimate_vmem(hw_t, w, cin, cout_p, hw_split, dtype=jnp.bfloat16):
    """Per-call VMEM need (pipelined blocks + main in-kernel temporaries)."""
    rows = hw_t // w
    conv = (2 * _block_vmem_bytes((1, 9, hw_t, cin), dtype)
            + 2 * _block_vmem_bytes((NPHASE, NTAPS, cin, cout_p), dtype)
            + 2 * _block_vmem_bytes((1, NPHASE, hw_t, cout_p), dtype)
            + 2 * _block_vmem_bytes((1, 1, 2, cout_p), jnp.float32)
            + 2 * _block_vmem_bytes((hw_t, cout_p), jnp.float32))
    norm = (2 * _block_vmem_bytes((1, NPHASE, hw_t, cout_p), dtype)
            + 2 * _block_vmem_bytes((1, hw_split, 2, cout_p), jnp.float32)
            + 2 * _block_vmem_bytes((1, rows, 2, w, 2 * cout_p), jnp.float32)
            + 2 * _block_vmem_bytes((NPHASE, hw_t, cout_p), jnp.float32))
    return conv, norm


def _pick_hw_tile(h, w, cin, cout_p, budget):
    """Largest whole-row HW tile (sublane-friendly) fitting the VMEM budget."""
    hw_in = h * w
    cands = []
    for rows in range(h, 0, -1):
        if h % rows:
            continue
        t = rows * w
        if t % 16 and t != hw_in:      # bf16 packs 16 rows per vreg
            continue
        cands.append(t)
    if not cands:
        cands = [hw_in]
    for t in cands:                    # largest first
        conv, norm = _estimate_vmem(t, w, cin, cout_p, 2)
        if int(max(conv, norm) * 1.25) + (2 << 20) <= budget:
            return t
    return cands[-1]


def _resident_spec(shape, index_map):
    """BlockSpec whose block index never changes: request a single buffer."""
    try:
        return pl.BlockSpec(shape, index_map, pipeline_mode=pl.Buffered(1))
    except Exception:                  # API without pipeline_mode: fall back
        return pl.BlockSpec(shape, index_map)


# ---------------------------------------------------------------------------
# wrapper-side layout plumbing
# ---------------------------------------------------------------------------
def _shift_views(x_nhwc):
    """The 9 distinct shifted views used by the k=4 / stride-2 decomposition."""
    n, h, w, cin = x_nhwc.shape
    x_pad = jnp.pad(x_nhwc, ((0, 0), (1, 1), (1, 1), (0, 0)))
    views = [x_pad[:, dr:dr + h, dc:dc + w, :].reshape(n, h * w, cin)
             for dr in range(3) for dc in range(3)]      # view index = 3*dr+dc
    return jnp.stack(views, axis=1)                      # (N, 9, HW, Cin)


def _phase_tap_tables(w_t, cout_p, dtype):
    """Static per-phase tap->view indices and (4, 4, Cin, Cout_p) weights."""
    cout = w_t.shape[1]
    view_idx, w_list = [], []
    for ph in range(2):
        for pw in range(2):
            vrow, wrow = [], []
            for rs, kh in _TAP_CFG[ph]:
                for cs, kw in _TAP_CFG[pw]:
                    vrow.append(3 * rs + cs)
                    wk = w_t[:, :, kh, kw]               # (Cin, Cout)
                    if cout_p != cout:
                        wk = jnp.pad(wk, ((0, 0), (0, cout_p - cout)))
                    wrow.append(wk)
            view_idx.append(tuple(vrow))
            w_list.append(jnp.stack(wrow, axis=0))       # (4, Cin, Cout_p)
    return tuple(view_idx), jnp.stack(w_list, axis=0).astype(dtype)


def unet_upsample(x, w_t, skip, *, hw_tile=None, compute_dtype=jnp.bfloat16):
    """x: (N, Cin, H, W); w_t: (Cin, Cout, 4, 4); skip: (N, Cskip, 2H, 2W).
    Returns (N, Cout+Cskip, 2H, 2W) float32."""
    n, cin, h, w = x.shape
    cout = w_t.shape[1]
    hw_in = h * w
    cout_p = _ceil_to(cout, 128)       # lane-dense stores (pad channels)

    cap = _vmem_budget_bytes()
    if hw_tile is None:
        hw_tile = _pick_hw_tile(h, w, cin, cout_p, cap)
    hw_tile = min(hw_tile, hw_in)
    assert hw_in % hw_tile == 0 and hw_tile % w == 0, (hw_tile, h, w)
    assert hw_tile % 16 == 0 or hw_tile == hw_in, hw_tile
    rows_t = hw_tile // w
    num_t = hw_in // hw_tile
    # split the HW-tile axis into "parallel" halves so a second TensorCore
    # (v7x megacore) has work even at batch=1; per-half partial statistics.
    hw_split = 2 if (num_t % 2 == 0 and num_t >= 2) else 1
    tpc = num_t // hw_split

    # bf16 BEFORE the view materialization (halves wrapper-side HBM traffic).
    x_nhwc = jnp.transpose(x, (0, 2, 3, 1)).astype(compute_dtype)
    x_views = _shift_views(x_nhwc)                       # (N, 9, HW, Cin)
    view_idx, w_phases = _phase_tap_tables(w_t, cout_p, compute_dtype)

    conv_need, norm_need = _estimate_vmem(hw_tile, w, cin, cout_p, hw_split)
    conv_limit = int(min(cap, max(2 * conv_need + (4 << 20), 16 << 20)))
    norm_limit = int(min(cap, max(2 * norm_need + (4 << 20), 16 << 20)))

    isz = jnp.dtype(compute_dtype).itemsize
    conv_cost = pl.CostEstimate(
        flops=2 * n * NPHASE * NTAPS * hw_in * cin * cout_p,
        transcendentals=0,
        bytes_accessed=(x_views.size * isz + w_phases.size * isz
                        + n * NPHASE * hw_in * cout_p * isz
                        + n * hw_split * 2 * cout_p * 4),
    )

    y_raw, stats = pl.pallas_call(
        functools.partial(conv_stats_kernel, view_idx=view_idx),
        out_shape=(
            jax.ShapeDtypeStruct((n, NPHASE, hw_in, cout_p), compute_dtype),
            jax.ShapeDtypeStruct((n, hw_split, 2, cout_p), jnp.float32),
        ),
        grid=(n, hw_split, tpc),
        in_specs=[
            pl.BlockSpec((1, 9, hw_tile, cin),
                         lambda b, s, t: (b, 0, s * tpc + t, 0)),
            _resident_spec((NPHASE, NTAPS, cin, cout_p),
                           lambda b, s, t: (0, 0, 0, 0)),
        ],
        out_specs=(
            pl.BlockSpec((1, NPHASE, hw_tile, cout_p),
                         lambda b, s, t: (b, 0, s * tpc + t, 0)),
            pl.BlockSpec((1, 1, 2, cout_p), lambda b, s, t: (b, s, 0, 0)),
        ),
        compiler_params=pltpu.CompilerParams(
            dimension_semantics=("parallel", "parallel", "arbitrary"),
            vmem_limit_bytes=conv_limit,
        ),
        cost_estimate=conv_cost,
    )(x_views, w_phases)

    norm_cost = pl.CostEstimate(
        flops=6 * n * NPHASE * hw_in * cout_p,
        transcendentals=n * cout_p,
        bytes_accessed=(n * NPHASE * hw_in * cout_p * (isz + 4)
                        + n * hw_split * 2 * cout_p * 4),
    )

    y_ds = pl.pallas_call(
        functools.partial(norm_relu_kernel,
                          inv_count=1.0 / float(NPHASE * hw_in)),
        out_shape=jax.ShapeDtypeStruct((n, h, 2, w, 2 * cout_p), jnp.float32),
        grid=(n, num_t),
        in_specs=[
            pl.BlockSpec((1, NPHASE, hw_tile, cout_p),
                         lambda b, t: (b, 0, t, 0)),
            pl.BlockSpec((1, hw_split, 2, cout_p), lambda b, t: (b, 0, 0, 0)),
        ],
        out_specs=pl.BlockSpec((1, rows_t, 2, w, 2 * cout_p),
                               lambda b, t: (b, t, 0, 0, 0)),
        compiler_params=pltpu.CompilerParams(
            dimension_semantics=("parallel", "parallel"),
            vmem_limit_bytes=norm_limit,
        ),
        cost_estimate=norm_cost,
    )(y_raw, stats)

    # (N, H, 2, W, 2*Cout_p) is element-order identical to (N, 2H, 2W, Cout_p).
    y = y_ds.reshape(n, 2 * h, 2 * w, cout_p)
    if cout_p != cout:
        y = y[..., :cout]          # drop lane padding (fuses with transpose)
    y = jnp.transpose(y, (0, 3, 1, 2))                   # NHWC -> NCHW
    # skip concat stays in the wrapper: skip bytes never transit the kernels.
    return jnp.concatenate([y, skip.astype(y.dtype)], axis=1)


# ---------------------------------------------------------------------------
# independent NumPy reference
# ---------------------------------------------------------------------------
def numpy_reference(x, w_t, skip):
    """Scatter-form ConvTranspose2d + InstanceNorm + ReLU + concat (float64)."""
    x = np.asarray(x, np.float64)
    w_t = np.asarray(w_t, np.float64)
    skip = np.asarray(skip, np.float64)
    n, cin, h, w = x.shape
    cout = w_t.shape[1]
    ho, wo = 2 * h, 2 * w
    ypad = np.zeros((n, cout, ho + 2, wo + 2), np.float64)
    for kh in range(KSIZE):
        for kw in range(KSIZE):
            contrib = np.einsum("nchw,cd->ndhw", x, w_t[:, :, kh, kw])
            ypad[:, :, kh:kh + 2 * h:2, kw:kw + 2 * w:2] += contrib
    y = ypad[:, :, 1:1 + ho, 1:1 + wo]          # crop for padding=1
    mean = y.mean(axis=(2, 3), keepdims=True)
    var = y.var(axis=(2, 3), keepdims=True)     # biased, matches InstanceNorm2d
    y = (y - mean) / np.sqrt(var + EPS)
    y = np.maximum(y, 0.0)
    return np.concatenate([y, skip], axis=1)


if __name__ == "__main__":
    # small shapes: batch=2, Cin=8, Cout=8, Cskip=8, spatial 8 -> 16
    N, CIN, COUT, CSKIP, H, W = 2, 8, 8, 8, 8, 8

    key = jax.random.PRNGKey(0)
    kx, kw, ks = jax.random.split(key, 3)
    x = jax.random.normal(kx, (N, CIN, H, W), jnp.float32)
    # ConvTranspose2d weight shape: (in_channels, out_channels, kH, kW)
    w_t = 0.1 * jax.random.normal(kw, (CIN, COUT, KSIZE, KSIZE), jnp.float32)
    skip = jax.random.normal(ks, (N, CSKIP, 2 * H, 2 * W), jnp.float32)

    # hw_tile=16 -> 4 HW tiles per sample: exercises BOTH the split
    # ("parallel") partial-stats axis and the accumulated ("arbitrary") axis.
    fn = jax.jit(functools.partial(unet_upsample, hw_tile=16))
    out = jax.block_until_ready(fn(x, w_t, skip))

    ref = numpy_reference(x, w_t, skip)
    assert out.shape == (N, COUT + CSKIP, 2 * H, 2 * W), out.shape
    # bf16 MXU inputs + bf16 conv intermediate with f32 accumulation/stats.
    np.testing.assert_allclose(np.asarray(out), ref, rtol=5e-2, atol=5e-2)

    print("KERNEL_OK")
</pallas_src>

<mosaic_0001>
module attributes {stable_mosaic.version = 11 : i64} {
  func.func @norm_relu_kernel(%arg0: i32, %arg1: i32, %arg2: memref<1x4x16x128xbf16, #tpu.memory_space<vmem>>, %arg3: memref<1x2x2x128xf32, #tpu.memory_space<vmem>>, %arg4: memref<1x2x2x8x256xf32, #tpu.memory_space<vmem>>) attributes {dimension_semantics = [#tpu.dimension_semantics<parallel>, #tpu.dimension_semantics<parallel>], iteration_bounds = array<i64: 2, 4>, scalar_prefetch = 0 : i64, scratch_operands = 0 : i64, tpu.core_type = #tpu.core_type<tc>, window_params = [{transform_indices = @transform_0, window_bounds = array<i64: 1, 4, 16, 128>}, {transform_indices = @transform_1, window_bounds = array<i64: 1, 2, 2, 128>}, {transform_indices = @transform_2, window_bounds = array<i64: 1, 2, 2, 8, 256>}]} {
    %c0 = arith.constant 0 : index
    %c0_0 = arith.constant 0 : index
    %c0_1 = arith.constant 0 : index
    %c0_2 = arith.constant 0 : index
    %0 = vector.load %arg3[%c0, %c0_0, %c0_1, %c0_2] : memref<1x2x2x128xf32, #tpu.memory_space<vmem>>, vector<1x2x2x128xf32>
    %1 = vector.shape_cast %0 : vector<1x2x2x128xf32> to vector<2x2x128xf32>
    %cst = arith.constant dense<0.000000e+00> : vector<2x128xf32>
    %2 = vector.multi_reduction <add>, %1, %cst [0] : vector<2x2x128xf32> to vector<2x128xf32>
    %3 = vector.extract_strided_slice %2 {offsets = [0, 0], sizes = [1, 128], strides = [1, 1]} : vector<2x128xf32> to vector<1x128xf32>
    %cst_3 = arith.constant 3.906250e-03 : f32
    %4 = vector.broadcast %cst_3 : f32 to vector<1x128xf32>
    %5 = arith.mulf %3, %4 : vector<1x128xf32>
    %6 = vector.extract_strided_slice %2 {offsets = [1, 0], sizes = [1, 128], strides = [1, 1]} : vector<2x128xf32> to vector<1x128xf32>
    %cst_4 = arith.constant 3.906250e-03 : f32
    %7 = vector.broadcast %cst_4 : f32 to vector<1x128xf32>
    %8 = arith.mulf %6, %7 : vector<1x128xf32>
    %9 = arith.mulf %5, %5 : vector<1x128xf32>
    %10 = arith.subf %8, %9 : vector<1x128xf32>
    %cst_5 = arith.constant 0.000000e+00 : f32
    %11 = vector.broadcast %cst_5 : f32 to vector<1x128xf32>
    %12 = arith.maximumf %10, %11 : vector<1x128xf32>
    %cst_6 = arith.constant 9.99999974E-6 : f32
    %13 = vector.broadcast %cst_6 : f32 to vector<1x128xf32>
    %14 = arith.addf %12, %13 : vector<1x128xf32>
    %15 = math.rsqrt %14 : vector<1x128xf32>
    %16 = arith.mulf %5, %15 : vector<1x128xf32>
    %c0_7 = arith.constant 0 : index
    %c0_8 = arith.constant 0 : index
    %c0_9 = arith.constant 0 : index
    %c0_10 = arith.constant 0 : index
    %17 = vector.load %arg2[%c0_7, %c0_8, %c0_9, %c0_10] : memref<1x4x16x128xbf16, #tpu.memory_space<vmem>>, vector<1x4x16x128xbf16>
    %18 = vector.shape_cast %17 : vector<1x4x16x128xbf16> to vector<4x16x128xbf16>
    %19 = arith.extf %18 : vector<4x16x128xbf16> to vector<4x16x128xf32>
    %20 = vector.shape_cast %15 : vector<1x128xf32> to vector<1x1x128xf32>
    %21 = vector.broadcast %20 : vector<1x1x128xf32> to vector<4x16x128xf32>
    %22 = arith.mulf %19, %21 : vector<4x16x128xf32>
    %23 = vector.shape_cast %16 : vector<1x128xf32> to vector<1x1x128xf32>
    %24 = vector.broadcast %23 : vector<1x1x128xf32> to vector<4x16x128xf32>
    %25 = arith.subf %22, %24 : vector<4x16x128xf32>
    %cst_11 = arith.constant 0.000000e+00 : f32
    %26 = vector.broadcast %cst_11 : f32 to vector<4x16x128xf32>
    %27 = arith.maximumf %25, %26 : vector<4x16x128xf32>
    %28 = vector.extract_strided_slice %27 {offsets = [0, 0, 0], sizes = [1, 16, 128], strides = [1, 1, 1]} : vector<4x16x128xf32> to vector<1x16x128xf32>
    %29 = vector.shape_cast %28 : vector<1x16x128xf32> to vector<16x128xf32>
    %30 = vector.shape_cast %29 : vector<16x128xf32> to vector<2x8x128xf32>
    %c0_12 = arith.constant 0 : index
    %c0_13 = arith.constant 0 : index
    %c0_14 = arith.constant 0 : index
    %c0_15 = arith.constant 0 : index
    %c0_16 = arith.constant 0 : index
    %31 = vector.load %arg4[%c0_12, %c0_13, %c0_14, %c0_15, %c0_16] : memref<1x2x2x8x256xf32, #tpu.memory_space<vmem>>, vector<1x2x1x8x128xf32>
    %32 = vector.shape_cast %31 : vector<1x2x1x8x128xf32> to vector<2x8x128xf32>
    %33 = vector.shape_cast %30 : vector<2x8x128xf32> to vector<1x2x1x8x128xf32>
    tpu.vector_store %arg4[%c0_12, %c0_13, %c0_14, %c0_15, %c0_16], %33 {strides = array<i32>} : memref<1x2x2x8x256xf32, #tpu.memory_space<vmem>>, vector<1x2x1x8x128xf32>,
    %34 = vector.extract_strided_slice %27 {offsets = [1, 0, 0], sizes = [1, 16, 128], strides = [1, 1, 1]} : vector<4x16x128xf32> to vector<1x16x128xf32>
    %35 = vector.shape_cast %34 : vector<1x16x128xf32> to vector<16x128xf32>
    %36 = vector.shape_cast %35 : vector<16x128xf32> to vector<2x8x128xf32>
    %c0_17 = arith.constant 0 : index
    %c0_18 = arith.constant 0 : index
    %c0_19 = arith.constant 0 : index
    %c0_20 = arith.constant 0 : index
    %c128 = arith.constant 128 : index
    %37 = vector.load %arg4[%c0_17, %c0_18, %c0_19, %c0_20, %c128] : memref<1x2x2x8x256xf32, #tpu.memory_space<vmem>>, vector<1x2x1x8x128xf32>
    %38 = vector.shape_cast %37 : vector<1x2x1x8x128xf32> to vector<2x8x128xf32>
    %39 = vector.shape_cast %36 : vector<2x8x128xf32> to vector<1x2x1x8x128xf32>
    tpu.vector_store %arg4[%c0_17, %c0_18, %c0_19, %c0_20, %c128], %39 {strides = array<i32>} : memref<1x2x2x8x256xf32, #tpu.memory_space<vmem>>, vector<1x2x1x8x128xf32>,
    %40 = vector.extract_strided_slice %27 {offsets = [2, 0, 0], sizes = [1, 16, 128], strides = [1, 1, 1]} : vector<4x16x128xf32> to vector<1x16x128xf32>
    %41 = vector.shape_cast %40 : vector<1x16x128xf32> to vector<16x128xf32>
    %42 = vector.shape_cast %41 : vector<16x128xf32> to vector<2x8x128xf32>
    %c0_21 = arith.constant 0 : index
    %c0_22 = arith.constant 0 : index
    %c1 = arith.constant 1 : index
    %c0_23 = arith.constant 0 : index
    %c0_24 = arith.constant 0 : index
    %43 = vector.load %arg4[%c0_21, %c0_22, %c1, %c0_23, %c0_24] : memref<1x2x2x8x256xf32, #tpu.memory_space<vmem>>, vector<1x2x1x8x128xf32>
    %44 = vector.shape_cast %43 : vector<1x2x1x8x128xf32> to vector<2x8x128xf32>
    %45 = vector.shape_cast %42 : vector<2x8x128xf32> to vector<1x2x1x8x128xf32>
    tpu.vector_store %arg4[%c0_21, %c0_22, %c1, %c0_23, %c0_24], %45 {strides = array<i32>} : memref<1x2x2x8x256xf32, #tpu.memory_space<vmem>>, vector<1x2x1x8x128xf32>,
    %46 = vector.extract_strided_slice %27 {offsets = [3, 0, 0], sizes = [1, 16, 128], strides = [1, 1, 1]} : vector<4x16x128xf32> to vector<1x16x128xf32>
    %47 = vector.shape_cast %46 : vector<1x16x128xf32> to vector<16x128xf32>
    %48 = vector.shape_cast %47 : vector<16x128xf32> to vector<2x8x128xf32>
    %c0_25 = arith.constant 0 : index
    %c0_26 = arith.constant 0 : index
    %c1_27 = arith.constant 1 : index
    %c0_28 = arith.constant 0 : index
    %c128_29 = arith.constant 128 : index
    %49 = vector.load %arg4[%c0_25, %c0_26, %c1_27, %c0_28, %c128_29] : memref<1x2x2x8x256xf32, #tpu.memory_space<vmem>>, vector<1x2x1x8x128xf32>
    %50 = vector.shape_cast %49 : vector<1x2x1x8x128xf32> to vector<2x8x128xf32>
    %51 = vector.shape_cast %48 : vector<2x8x128xf32> to vector<1x2x1x8x128xf32>
    tpu.vector_store %arg4[%c0_25, %c0_26, %c1_27, %c0_28, %c128_29], %51 {strides = array<i32>} : memref<1x2x2x8x256xf32, #tpu.memory_space<vmem>>, vector<1x2x1x8x128xf32>,
    return
  }
  func.func @transform_0(%arg0: i32, %arg1: i32) -> (i32, i32, i32, i32) {
    %c0_i32 = arith.constant 0 : i32
    %c0_i32_0 = arith.constant 0 : i32
    %c0_i32_1 = arith.constant 0 : i32
    return %arg0, %c0_i32, %arg1, %c0_i32_0 : i32, i32, i32, i32
  }
  func.func @transform_1(%arg0: i32, %arg1: i32) -> (i32, i32, i32, i32) {
    %c0_i32 = arith.constant 0 : i32
    %c0_i32_0 = arith.constant 0 : i32
    %c0_i32_1 = arith.constant 0 : i32
    %c0_i32_2 = arith.constant 0 : i32
    return %arg0, %c0_i32, %c0_i32_0, %c0_i32_1 : i32, i32, i32, i32
  }
  func.func @transform_2(%arg0: i32, %arg1: i32) -> (i32, i32, i32, i32, i32) {
    %c0_i32 = arith.constant 0 : i32
    %c0_i32_0 = arith.constant 0 : i32
    %c0_i32_1 = arith.constant 0 : i32
    %c0_i32_2 = arith.constant 0 : i32
    return %arg0, %arg1, %c0_i32, %c0_i32_0, %c0_i32_1 : i32, i32, i32, i32, i32
  }
}

module attributes {stable_mosaic.version = 11 : i64} {
  func.func @conv_stats_kernel(%arg0: i32, %arg1: i32, %arg2: i32, %arg3: memref<1x9x16x8xbf16, #tpu.memory_space<vmem>>, %arg4: memref<4x4x8x128xbf16, #tpu.memory_space<vmem>>, %arg5: memref<1x4x16x128xbf16, #tpu.memory_space<vmem>>, %arg6: memref<1x1x2x128xf32, #tpu.memory_space<vmem>>) attributes {dimension_semantics = [#tpu.dimension_semantics<parallel>, #tpu.dimension_semantics<parallel>, #tpu.dimension_semantics<arbitrary>], iteration_bounds = array<i64: 2, 2, 2>, scalar_prefetch = 0 : i64, scratch_operands = 0 : i64, tpu.core_type = #tpu.core_type<tc>, window_params = [{transform_indices = @transform_0, window_bounds = array<i64: 1, 9, 16, 8>}, {pipeline_mode = #tpu.pipeline_mode<synchronous>, transform_indices = @transform_1, window_bounds = array<i64: 4, 4, 8, 128>}, {transform_indices = @transform_2, window_bounds = array<i64: 1, 4, 16, 128>}, {transform_indices = @transform_3, window_bounds = array<i64: 1, 1, 2, 128>}]} {
    %c0 = arith.constant 0 : index
    %c4 = arith.constant 4 : index
    %c0_0 = arith.constant 0 : index
    %c0_1 = arith.constant 0 : index
    %0 = vector.load %arg3[%c0, %c4, %c0_0, %c0_1] : memref<1x9x16x8xbf16, #tpu.memory_space<vmem>>, vector<1x1x16x8xbf16>
    %1 = vector.shape_cast %0 : vector<1x1x16x8xbf16> to vector<16x8xbf16>
    %c0_2 = arith.constant 0 : index
    %c0_3 = arith.constant 0 : index
    %c0_4 = arith.constant 0 : index
    %c0_5 = arith.constant 0 : index
    %2 = vector.load %arg4[%c0_2, %c0_3, %c0_4, %c0_5] : memref<4x4x8x128xbf16, #tpu.memory_space<vmem>>, vector<1x1x8x128xbf16>
    %3 = vector.shape_cast %2 : vector<1x1x8x128xbf16> to vector<8x128xbf16>
    %cst = arith.constant dense<0.000000e+00> : vector<16x128xf32>
    %4 = tpu.matmul %1, %3, %cst {dimension_numbers = #tpu.dot_dimension_numbers<[1], [0], [0], [1], [0, 0, 1, 1], [], []>} : vector<16x8xbf16>, vector<8x128xbf16>, vector<16x128xf32> -> vector<16x128xf32>
    %c0_6 = arith.constant 0 : index
    %c3 = arith.constant 3 : index
    %c0_7 = arith.constant 0 : index
    %c0_8 = arith.constant 0 : index
    %5 = vector.load %arg3[%c0_6, %c3, %c0_7, %c0_8] : memref<1x9x16x8xbf16, #tpu.memory_space<vmem>>, vector<1x1x16x8xbf16>
    %6 = vector.shape_cast %5 : vector<1x1x16x8xbf16> to vector<16x8xbf16>
    %c0_9 = arith.constant 0 : index
    %c1 = arith.constant 1 : index
    %c0_10 = arith.constant 0 : index
    %c0_11 = arith.constant 0 : index
    %7 = vector.load %arg4[%c0_9, %c1, %c0_10, %c0_11] : memref<4x4x8x128xbf16, #tpu.memory_space<vmem>>, vector<1x1x8x128xbf16>
    %8 = vector.shape_cast %7 : vector<1x1x8x128xbf16> to vector<8x128xbf16>
    %cst_12 = arith.constant dense<0.000000e+00> : vector<16x128xf32>
    %9 = tpu.matmul %6, %8, %cst_12 {dimension_numbers = #tpu.dot_dimension_numbers<[1], [0], [0], [1], [0, 0, 1, 1], [], []>} : vector<16x8xbf16>, vector<8x128xbf16>, vector<16x128xf32> -> vector<16x128xf32>
    %10 = arith.addf %4, %9 : vector<16x128xf32>
    %c0_13 = arith.constant 0 : index
    %c1_14 = arith.constant 1 : index
    %c0_15 = arith.constant 0 : index
    %c0_16 = arith.constant 0 : index
    %11 = vector.load %arg3[%c0_13, %c1_14, %c0_15, %c0_16] : memref<1x9x16x8xbf16, #tpu.memory_space<vmem>>, vector<1x1x16x8xbf16>
    %12 = vector.shape_cast %11 : vector<1x1x16x8xbf16> to vector<16x8xbf16>
    %c0_17 = arith.constant 0 : index
    %c2 = arith.constant 2 : index
    %c0_18 = arith.constant 0 : index
    %c0_19 = arith.constant 0 : index
    %13 = vector.load %arg4[%c0_17, %c2, %c0_18, %c0_19] : memref<4x4x8x128xbf16, #tpu.memory_space<vmem>>, vector<1x1x8x128xbf16>
    %14 = vector.shape_cast %13 : vector<1x1x8x128xbf16> to vector<8x128xbf16>
    %cst_20 = arith.constant dense<0.000000e+00> : vector<16x128xf32>
    %15 = tpu.matmul %12, %14, %cst_20 {dimension_numbers = #tpu.dot_dimension_numbers<[1], [0], [0], [1], [0, 0, 1, 1], [], []>} : vector<16x8xbf16>, vector<8x128xbf16>, vector<16x128xf32> -> vector<16x128xf32>
    %16 = arith.addf %10, %15 : vector<16x128xf32>
    %c0_21 = arith.constant 0 : index
    %c0_22 = arith.constant 0 : index
    %c0_23 = arith.constant 0 : index
    %c0_24 = arith.constant 0 : index
    %17 = vector.load %arg3[%c0_21, %c0_22, %c0_23, %c0_24] : memref<1x9x16x8xbf16, #tpu.memory_space<vmem>>, vector<1x1x16x8xbf16>
    %18 = vector.shape_cast %17 : vector<1x1x16x8xbf16> to vector<16x8xbf16>
    %c0_25 = arith.constant 0 : index
    %c3_26 = arith.constant 3 : index
    %c0_27 = arith.constant 0 : index
    %c0_28 = arith.constant 0 : index
    %19 = vector.load %arg4[%c0_25, %c3_26, %c0_27, %c0_28] : memref<4x4x8x128xbf16, #tpu.memory_space<vmem>>, vector<1x1x8x128xbf16>
    %20 = vector.shape_cast %19 : vector<1x1x8x128xbf16> to vector<8x128xbf16>
    %cst_29 = arith.constant dense<0.000000e+00> : vector<16x128xf32>
    %21 = tpu.matmul %18, %20, %cst_29 {dimension_numbers = #tpu.dot_dimension_numbers<[1], [0], [0], [1], [0, 0, 1, 1], [], []>} : vector<16x8xbf16>, vector<8x128xbf16>, vector<16x128xf32> -> vector<16x128xf32>
    %22 = arith.addf %16, %21 : vector<16x128xf32>
    %23 = arith.truncf %22 : vector<16x128xf32> to vector<16x128xbf16>
    %c0_30 = arith.constant 0 : index
    %c0_31 = arith.constant 0 : index
    %c0_32 = arith.constant 0 : index
    %c0_33 = arith.constant 0 : index
    %24 = vector.load %arg5[%c0_30, %c0_31, %c0_32, %c0_33] : memref<1x4x16x128xbf16, #tpu.memory_space<vmem>>, vector<1x1x16x128xbf16>
    %25 = vector.shape_cast %24 : vector<1x1x16x128xbf16> to vector<16x128xbf16>
    %26 = vector.shape_cast %23 : vector<16x128xbf16> to vector<1x1x16x128xbf16>
    tpu.vector_store %arg5[%c0_30, %c0_31, %c0_32, %c0_33], %26 {strides = array<i32>} : memref<1x4x16x128xbf16, #tpu.memory_space<vmem>>, vector<1x1x16x128xbf16>,
    %cst_34 = arith.constant dense<0.000000e+00> : vector<128xf32>
    %27 = vector.multi_reduction <add>, %22, %cst_34 [0] : vector<16x128xf32> to vector<128xf32>
    %28 = vector.shape_cast %27 : vector<128xf32> to vector<1x128xf32>
    %29 = arith.mulf %22, %22 : vector<16x128xf32>
    %cst_35 = arith.constant dense<0.000000e+00> : vector<128xf32>
    %30 = vector.multi_reduction <add>, %29, %cst_35 [0] : vector<16x128xf32> to vector<128xf32>
    %31 = vector.shape_cast %30 : vector<128xf32> to vector<1x128xf32>
    %c0_36 = arith.constant 0 : index
    %c4_37 = arith.constant 4 : index
    %c0_38 = arith.constant 0 : index
    %c0_39 = arith.constant 0 : index
    %32 = vector.load %arg3[%c0_36, %c4_37, %c0_38, %c0_39] : memref<1x9x16x8xbf16, #tpu.memory_space<vmem>>, vector<1x1x16x8xbf16>
    %33 = vector.shape_cast %32 : vector<1x1x16x8xbf16> to vector<16x8xbf16>
    %c1_40 = arith.constant 1 : index
    %c0_41 = arith.constant 0 : index
    %c0_42 = arith.constant 0 : index
    %c0_43 = arith.constant 0 : index
    %34 = vector.load %arg4[%c1_40, %c0_41, %c0_42, %c0_43] : memref<4x4x8x128xbf16, #tpu.memory_space<vmem>>, vector<1x1x8x128xbf16>
    %35 = vector.shape_cast %34 : vector<1x1x8x128xbf16> to vector<8x128xbf16>
    %cst_44 = arith.constant dense<0.000000e+00> : vector<16x128xf32>
    %36 = tpu.matmul %33, %35, %cst_44 {dimension_numbers = #tpu.dot_dimension_numbers<[1], [0], [0], [1], [0, 0, 1, 1], [], []>} : vector<16x8xbf16>, vector<8x128xbf16>, vector<16x128xf32> -> vector<16x128xf32>
    %c0_45 = arith.constant 0 : index
    %c5 = arith.constant 5 : index
    %c0_46 = arith.constant 0 : index
    %c0_47 = arith.constant 0 : index
    %37 = vector.load %arg3[%c0_45, %c5, %c0_46, %c0_47] : memref<1x9x16x8xbf16, #tpu.memory_space<vmem>>, vector<1x1x16x8xbf16>
    %38 = vector.shape_cast %37 : vector<1x1x16x8xbf16> to vector<16x8xbf16>
    %c1_48 = arith.constant 1 : index
    %c1_49 = arith.constant 1 : index
    %c0_50 = arith.constant 0 : index
    %c0_51 = arith.constant 0 : index
    %39 = vector.load %arg4[%c1_48, %c1_49, %c0_50, %c0_51] : memref<4x4x8x128xbf16, #tpu.memory_space<vmem>>, vector<1x1x8x128xbf16>
    %40 = vector.shape_cast %39 : vector<1x1x8x128xbf16> to vector<8x128xbf16>
    %cst_52 = arith.constant dense<0.000000e+00> : vector<16x128xf32>
    %41 = tpu.matmul %38, %40, %cst_52 {dimension_numbers = #tpu.dot_dimension_numbers<[1], [0], [0], [1], [0, 0, 1, 1], [], []>} : vector<16x8xbf16>, vector<8x128xbf16>, vector<16x128xf32> -> vector<16x128xf32>
    %42 = arith.addf %36, %41 : vector<16x128xf32>
    %c0_53 = arith.constant 0 : index
    %c1_54 = arith.constant 1 : index
    %c0_55 = arith.constant 0 : index
    %c0_56 = arith.constant 0 : index
    %43 = vector.load %arg3[%c0_53, %c1_54, %c0_55, %c0_56] : memref<1x9x16x8xbf16, #tpu.memory_space<vmem>>, vector<1x1x16x8xbf16>
    %44 = vector.shape_cast %43 : vector<1x1x16x8xbf16> to vector<16x8xbf16>
    %c1_57 = arith.constant 1 : index
    %c2_58 = arith.constant 2 : index
    %c0_59 = arith.constant 0 : index
    %c0_60 = arith.constant 0 : index
    %45 = vector.load %arg4[%c1_57, %c2_58, %c0_59, %c0_60] : memref<4x4x8x128xbf16, #tpu.memory_space<vmem>>, vector<1x1x8x128xbf16>
    %46 = vector.shape_cast %45 : vector<1x1x8x128xbf16> to vector<8x128xbf16>
    %cst_61 = arith.constant dense<0.000000e+00> : vector<16x128xf32>
    %47 = tpu.matmul %44, %46, %cst_61 {dimension_numbers = #tpu.dot_dimension_numbers<[1], [0], [0], [1], [0, 0, 1, 1], [], []>} : vector<16x8xbf16>, vector<8x128xbf16>, vector<16x128xf32> -> vector<16x128xf32>
    %48 = arith.addf %42, %47 : vector<16x128xf32>
    %c0_62 = arith.constant 0 : index
    %c2_63 = arith.constant 2 : index
    %c0_64 = arith.constant 0 : index
    %c0_65 = arith.constant 0 : index
    %49 = vector.load %arg3[%c0_62, %c2_63, %c0_64, %c0_65] : memref<1x9x16x8xbf16, #tpu.memory_space<vmem>>, vector<1x1x16x8xbf16>
    %50 = vector.shape_cast %49 : vector<1x1x16x8xbf16> to vector<16x8xbf16>
    %c1_66 = arith.constant 1 : index
    %c3_67 = arith.constant 3 : index
    %c0_68 = arith.constant 0 : index
    %c0_69 = arith.constant 0 : index
    %51 = vector.load %arg4[%c1_66, %c3_67, %c0_68, %c0_69] : memref<4x4x8x128xbf16, #tpu.memory_space<vmem>>, vector<1x1x8x128xbf16>
    %52 = vector.shape_cast %51 : vector<1x1x8x128xbf16> to vector<8x128xbf16>
    %cst_70 = arith.constant dense<0.000000e+00> : vector<16x128xf32>
    %53 = tpu.matmul %50, %52, %cst_70 {dimension_numbers = #tpu.dot_dimension_numbers<[1], [0], [0], [1], [0, 0, 1, 1], [], []>} : vector<16x8xbf16>, vector<8x128xbf16>, vector<16x128xf32> -> vector<16x128xf32>
    %54 = arith.addf %48, %53 : vector<16x128xf32>
    %55 = arith.truncf %54 : vector<16x128xf32> to vector<16x128xbf16>
    %c0_71 = arith.constant 0 : index
    %c1_72 = arith.constant 1 : index
    %c0_73 = arith.constant 0 : index
    %c0_74 = arith.constant 0 : index
    %56 = vector.load %arg5[%c0_71, %c1_72, %c0_73, %c0_74] : memref<1x4x16x128xbf16, #tpu.memory_space<vmem>>, vector<1x1x16x128xbf16>
    %57 = vector.shape_cast %56 : vector<1x1x16x128xbf16> to vector<16x128xbf16>
    %58 = vector.shape_cast %55 : vector<16x128xbf16> to vector<1x1x16x128xbf16>
    tpu.vector_store %arg5[%c0_71, %c1_72, %c0_73, %c0_74], %58 {strides = array<i32>} : memref<1x4x16x128xbf16, #tpu.memory_space<vmem>>, vector<1x1x16x128xbf16>,
    %cst_75 = arith.constant dense<0.000000e+00> : vector<128xf32>
    %59 = vector.multi_reduction <add>, %54, %cst_75 [0] : vector<16x128xf32> to vector<128xf32>
    %60 = vector.shape_cast %59 : vector<128xf32> to vector<1x128xf32>
    %61 = arith.mulf %54, %54 : vector<16x128xf32>
    %cst_76 = arith.constant dense<0.000000e+00> : vector<128xf32>
    %62 = vector.multi_reduction <add>, %61, %cst_76 [0] : vector<16x128xf32> to vector<128xf32>
    %63 = vector.shape_cast %62 : vector<128xf32> to vector<1x128xf32>
    %64 = arith.addf %28, %60 : vector<1x128xf32>
    %65 = arith.addf %31, %63 : vector<1x128xf32>
    %c0_77 = arith.constant 0 : index
    %c4_78 = arith.constant 4 : index
    %c0_79 = arith.constant 0 : index
    %c0_80 = arith.constant 0 : index
    %66 = vector.load %arg3[%c0_77, %c4_78, %c0_79, %c0_80] : memref<1x9x16x8xbf16, #tpu.memory_space<vmem>>, vector<1x1x16x8xbf16>
    %67 = vector.shape_cast %66 : vector<1x1x16x8xbf16> to vector<16x8xbf16>
    %c2_81 = arith.constant 2 : index
    %c0_82 = arith.constant 0 : index
    %c0_83 = arith.constant 0 : index
    %c0_84 = arith.constant 0 : index
    %68 = vector.load %arg4[%c2_81, %c0_82, %c0_83, %c0_84] : memref<4x4x8x128xbf16, #tpu.memory_space<vmem>>, vector<1x1x8x128xbf16>
    %69 = vector.shape_cast %68 : vector<1x1x8x128xbf16> to vector<8x128xbf16>
    %cst_85 = arith.constant dense<0.000000e+00> : vector<16x128xf32>
    %70 = tpu.matmul %67, %69, %cst_85 {dimension_numbers = #tpu.dot_dimension_numbers<[1], [0], [0], [1], [0, 0, 1, 1], [], []>} : vector<16x8xbf16>, vector<8x128xbf16>, vector<16x128xf32> -> vector<16x128xf32>
    %c0_86 = arith.constant 0 : index
    %c3_87 = arith.constant 3 : index
    %c0_88 = arith.constant 0 : index
    %c0_89 = arith.constant 0 : index
    %71 = vector.load %arg3[%c0_86, %c3_87, %c0_88, %c0_89] : memref<1x9x16x8xbf16, #tpu.memory_space<vmem>>, vector<1x1x16x8xbf16>
    %72 = vector.shape_cast %71 : vector<1x1x16x8xbf16> to vector<16x8xbf16>
    %c2_90 = arith.constant 2 : index
    %c1_91 = arith.constant 1 : index
    %c0_92 = arith.constant 0 : index
    %c0_93 = arith.constant 0 : index
    %73 = vector.load %arg4[%c2_90, %c1_91, %c0_92, %c0_93] : memref<4x4x8x128xbf16, #tpu.memory_space<vmem>>, vector<1x1x8x128xbf16>
    %74 = vector.shape_cast %73 : vector<1x1x8x128xbf16> to vector<8x128xbf16>
    %cst_94 = arith.constant dense<0.000000e+00> : vector<16x128xf32>
    %75 = tpu.matmul %72, %74, %cst_94 {dimension_numbers = #tpu.dot_dimension_numbers<[1], [0], [0], [1], [0, 0, 1, 1], [], []>} : vector<16x8xbf16>, vector<8x128xbf16>, vector<16x128xf32> -> vector<16x128xf32>
    %76 = arith.addf %70, %75 : vector<16x128xf32>
    %c0_95 = arith.constant 0 : index
    %c7 = arith.constant 7 : index
    %c0_96 = arith.constant 0 : index
    %c0_97 = arith.constant 0 : index
    %77 = vector.load %arg3[%c0_95, %c7, %c0_96, %c0_97] : memref<1x9x16x8xbf16, #tpu.memory_space<vmem>>, vector<1x1x16x8xbf16>
    %78 = vector.shape_cast %77 : vector<1x1x16x8xbf16> to vector<16x8xbf16>
    %c2_98 = arith.constant 2 : index
    %c2_99 = arith.constant 2 : index
    %c0_100 = arith.constant 0 : index
    %c0_101 = arith.constant 0 : index
    %79 = vector.load %arg4[%c2_98, %c2_99, %c0_100, %c0_101] : memref<4x4x8x128xbf16, #tpu.memory_space<vmem>>, vector<1x1x8x128xbf16>
    %80 = vector.shape_cast %79 : vector<1x1x8x128xbf16> to vector<8x128xbf16>
    %cst_102 = arith.constant dense<0.000000e+00> : vector<16x128xf32>
    %81 = tpu.matmul %78, %80, %cst_102 {dimension_numbers = #tpu.dot_dimension_numbers<[1], [0], [0], [1], [0, 0, 1, 1], [], []>} : vector<16x8xbf16>, vector<8x128xbf16>, vector<16x128xf32> -> vector<16x128xf32>
    %82 = arith.addf %76, %81 : vector<16x128xf32>
    %c0_103 = arith.constant 0 : index
    %c6 = arith.constant 6 : index
    %c0_104 = arith.constant 0 : index
    %c0_105 = arith.constant 0 : index
    %83 = vector.load %arg3[%c0_103, %c6, %c0_104, %c0_105] : memref<1x9x16x8xbf16, #tpu.memory_space<vmem>>, vector<1x1x16x8xbf16>
    %84 = vector.shape_cast %83 : vector<1x1x16x8xbf16> to vector<16x8xbf16>
    %c2_106 = arith.constant 2 : index
    %c3_107 = arith.constant 3 : index
    %c0_108 = arith.constant 0 : index
    %c0_109 = arith.constant 0 : index
    %85 = vector.load %arg4[%c2_106, %c3_107, %c0_108, %c0_109] : memref<4x4x8x128xbf16, #tpu.memory_space<vmem>>, vector<1x1x8x128xbf16>
    %86 = vector.shape_cast %85 : vector<1x1x8x128xbf16> to vector<8x128xbf16>
    %cst_110 = arith.constant dense<0.000000e+00> : vector<16x128xf32>
    %87 = tpu.matmul %84, %86, %cst_110 {dimension_numbers = #tpu.dot_dimension_numbers<[1], [0], [0], [1], [0, 0, 1, 1], [], []>} : vector<16x8xbf16>, vector<8x128xbf16>, vector<16x128xf32> -> vector<16x128xf32>
    %88 = arith.addf %82, %87 : vector<16x128xf32>
    %89 = arith.truncf %88 : vector<16x128xf32> to vector<16x128xbf16>
    %c0_111 = arith.constant 0 : index
    %c2_112 = arith.constant 2 : index
    %c0_113 = arith.constant 0 : index
    %c0_114 = arith.constant 0 : index
    %90 = vector.load %arg5[%c0_111, %c2_112, %c0_113, %c0_114] : memref<1x4x16x128xbf16, #tpu.memory_space<vmem>>, vector<1x1x16x128xbf16>
    %91 = vector.shape_cast %90 : vector<1x1x16x128xbf16> to vector<16x128xbf16>
    %92 = vector.shape_cast %89 : vector<16x128xbf16> to vector<1x1x16x128xbf16>
    tpu.vector_store %arg5[%c0_111, %c2_112, %c0_113, %c0_114], %92 {strides = array<i32>} : memref<1x4x16x128xbf16, #tpu.memory_space<vmem>>, vector<1x1x16x128xbf16>,
    %cst_115 = arith.constant dense<0.000000e+00> : vector<128xf32>
    %93 = vector.multi_reduction <add>, %88, %cst_115 [0] : vector<16x128xf32> to vector<128xf32>
    %94 = vector.shape_cast %93 : vector<128xf32> to vector<1x128xf32>
    %95 = arith.mulf %88, %88 : vector<16x128xf32>
    %cst_116 = arith.constant dense<0.000000e+00> : vector<128xf32>
    %96 = vector.multi_reduction <add>, %95, %cst_116 [0] : vector<16x128xf32> to vector<128xf32>
    %97 = vector.shape_cast %96 : vector<128xf32> to vector<1x128xf32>
    %98 = arith.addf %64, %94 : vector<1x128xf32>
    %99 = arith.addf %65, %97 : vector<1x128xf32>
    %c0_117 = arith.constant 0 : index
    %c4_118 = arith.constant 4 : index
    %c0_119 = arith.constant 0 : index
    %c0_120 = arith.constant 0 : index
    %100 = vector.load %arg3[%c0_117, %c4_118, %c0_119, %c0_120] : memref<1x9x16x8xbf16, #tpu.memory_space<vmem>>, vector<1x1x16x8xbf16>
    %101 = vector.shape_cast %100 : vector<1x1x16x8xbf16> to vector<16x8xbf16>
    %c3_121 = arith.constant 3 : index
    %c0_122 = arith.constant 0 : index
    %c0_123 = arith.constant 0 : index
    %c0_124 = arith.constant 0 : index
    %102 = vector.load %arg4[%c3_121, %c0_122, %c0_123, %c0_124] : memref<4x4x8x128xbf16, #tpu.memory_space<vmem>>, vector<1x1x8x128xbf16>
    %103 = vector.shape_cast %102 : vector<1x1x8x128xbf16> to vector<8x128xbf16>
    %cst_125 = arith.constant dense<0.000000e+00> : vector<16x128xf32>
    %104 = tpu.matmul %101, %103, %cst_125 {dimension_numbers = #tpu.dot_dimension_numbers<[1], [0], [0], [1], [0, 0, 1, 1], [], []>} : vector<16x8xbf16>, vector<8x128xbf16>, vector<16x128xf32> -> vector<16x128xf32>
    %c0_126 = arith.constant 0 : index
    %c5_127 = arith.constant 5 : index
    %c0_128 = arith.constant 0 : index
    %c0_129 = arith.constant 0 : index
    %105 = vector.load %arg3[%c0_126, %c5_127, %c0_128, %c0_129] : memref<1x9x16x8xbf16, #tpu.memory_space<vmem>>, vector<1x1x16x8xbf16>
    %106 = vector.shape_cast %105 : vector<1x1x16x8xbf16> to vector<16x8xbf16>
    %c3_130 = arith.constant 3 : index
    %c1_131 = arith.constant 1 : index
    %c0_132 = arith.constant 0 : index
    %c0_133 = arith.constant 0 : index
    %107 = vector.load %arg4[%c3_130, %c1_131, %c0_132, %c0_133] : memref<4x4x8x128xbf16, #tpu.memory_space<vmem>>, vector<1x1x8x128xbf16>
    %108 = vector.shape_cast %107 : vector<1x1x8x128xbf16> to vector<8x128xbf16>
    %cst_134 = arith.constant dense<0.000000e+00> : vector<16x128xf32>
    %109 = tpu.matmul %106, %108, %cst_134 {dimension_numbers = #tpu.dot_dimension_numbers<[1], [0], [0], [1], [0, 0, 1, 1], [], []>} : vector<16x8xbf16>, vector<8x128xbf16>, vector<16x128xf32> -> vector<16x128xf32>
    %110 = arith.addf %104, %109 : vector<16x128xf32>
    %c0_135 = arith.constant 0 : index
    %c7_136 = arith.constant 7 : index
    %c0_137 = arith.constant 0 : index
    %c0_138 = arith.constant 0 : index
    %111 = vector.load %arg3[%c0_135, %c7_136, %c0_137, %c0_138] : memref<1x9x16x8xbf16, #tpu.memory_space<vmem>>, vector<1x1x16x8xbf16>
    %112 = vector.shape_cast %111 : vector<1x1x16x8xbf16> to vector<16x8xbf16>
    %c3_139 = arith.constant 3 : index
    %c2_140 = arith.constant 2 : index
    %c0_141 = arith.constant 0 : index
    %c0_142 = arith.constant 0 : index
    %113 = vector.load %arg4[%c3_139, %c2_140, %c0_141, %c0_142] : memref<4x4x8x128xbf16, #tpu.memory_space<vmem>>, vector<1x1x8x128xbf16>
    %114 = vector.shape_cast %113 : vector<1x1x8x128xbf16> to vector<8x128xbf16>
    %cst_143 = arith.constant dense<0.000000e+00> : vector<16x128xf32>
    %115 = tpu.matmul %112, %114, %cst_143 {dimension_numbers = #tpu.dot_dimension_numbers<[1], [0], [0], [1], [0, 0, 1, 1], [], []>} : vector<16x8xbf16>, vector<8x128xbf16>, vector<16x128xf32> -> vector<16x128xf32>
    %116 = arith.addf %110, %115 : vector<16x128xf32>
    %c0_144 = arith.constant 0 : index
    %c8 = arith.constant 8 : index
    %c0_145 = arith.constant 0 : index
    %c0_146 = arith.constant 0 : index
    %117 = vector.load %arg3[%c0_144, %c8, %c0_145, %c0_146] : memref<1x9x16x8xbf16, #tpu.memory_space<vmem>>, vector<1x1x16x8xbf16>
    %118 = vector.shape_cast %117 : vector<1x1x16x8xbf16> to vector<16x8xbf16>
    %c3_147 = arith.constant 3 : index
    %c3_148 = arith.constant 3 : index
    %c0_149 = arith.constant 0 : index
    %c0_150 = arith.constant 0 : index
    %119 = vector.load %arg4[%c3_147, %c3_148, %c0_149, %c0_150] : memref<4x4x8x128xbf16, #tpu.memory_space<vmem>>, vector<1x1x8x128xbf16>
    %120 = vector.shape_cast %119 : vector<1x1x8x128xbf16> to vector<8x128xbf16>
    %cst_151 = arith.constant dense<0.000000e+00> : vector<16x128xf32>
    %121 = tpu.matmul %118, %120, %cst_151 {dimension_numbers = #tpu.dot_dimension_numbers<[1], [0], [0], [1], [0, 0, 1, 1], [], []>} : vector<16x8xbf16>, vector<8x128xbf16>, vector<16x128xf32> -> vector<16x128xf32>
    %122 = arith.addf %116, %121 : vector<16x128xf32>
    %123 = arith.truncf %122 : vector<16x128xf32> to vector<16x128xbf16>
    %c0_152 = arith.constant 0 : index
    %c3_153 = arith.constant 3 : index
    %c0_154 = arith.constant 0 : index
    %c0_155 = arith.constant 0 : index
    %124 = vector.load %arg5[%c0_152, %c3_153, %c0_154, %c0_155] : memref<1x4x16x128xbf16, #tpu.memory_space<vmem>>, vector<1x1x16x128xbf16>
    %125 = vector.shape_cast %124 : vector<1x1x16x128xbf16> to vector<16x128xbf16>
    %126 = vector.shape_cast %123 : vector<16x128xbf16> to vector<1x1x16x128xbf16>
    tpu.vector_store %arg5[%c0_152, %c3_153, %c0_154, %c0_155], %126 {strides = array<i32>} : memref<1x4x16x128xbf16, #tpu.memory_space<vmem>>, vector<1x1x16x128xbf16>,
    %cst_156 = arith.constant dense<0.000000e+00> : vector<128xf32>
    %127 = vector.multi_reduction <add>, %122, %cst_156 [0] : vector<16x128xf32> to vector<128xf32>
    %128 = vector.shape_cast %127 : vector<128xf32> to vector<1x128xf32>
    %129 = arith.mulf %122, %122 : vector<16x128xf32>
    %cst_157 = arith.constant dense<0.000000e+00> : vector<128xf32>
    %130 = vector.multi_reduction <add>, %129, %cst_157 [0] : vector<16x128xf32> to vector<128xf32>
    %131 = vector.shape_cast %130 : vector<128xf32> to vector<1x128xf32>
    %132 = arith.addf %98, %128 : vector<1x128xf32>
    %133 = arith.addf %99, %131 : vector<1x128xf32>
    %134 = tpu.concatenate %132, %133 in 0 : vector<1x128xf32>, vector<1x128xf32> -> vector<2x128xf32>
    %c0_i32 = arith.constant 0 : i32
    %135 = arith.cmpi eq, %arg2, %c0_i32 : i32
    %136 = arith.extui %135 : i1 to i32
    %c0_i32_158 = arith.constant 0 : i32
    %137 = arith.cmpi ne, %136, %c0_i32_158 : i32
    scf.if %137 {
      %c0_161 = arith.constant 0 : index
      %c0_162 = arith.constant 0 : index
      %c0_163 = arith.constant 0 : index
      %c0_164 = arith.constant 0 : index
      %141 = vector.load %arg6[%c0_161, %c0_162, %c0_163, %c0_164] : memref<1x1x2x128xf32, #tpu.memory_space<vmem>>, vector<1x1x2x128xf32>
      %142 = vector.shape_cast %141 : vector<1x1x2x128xf32> to vector<2x128xf32>
      %143 = vector.shape_cast %134 : vector<2x128xf32> to vector<1x1x2x128xf32>
      tpu.vector_store %arg6[%c0_161, %c0_162, %c0_163, %c0_164], %143 {strides = array<i32>} : memref<1x1x2x128xf32, #tpu.memory_space<vmem>>, vector<1x1x2x128xf32>,
    } else {
    }
    %c0_i32_159 = arith.constant 0 : i32
    %138 = arith.cmpi sgt, %arg2, %c0_i32_159 : i32
    %139 = arith.extui %138 : i1 to i32
    %c0_i32_160 = arith.constant 0 : i32
    %140 = arith.cmpi ne, %139, %c0_i32_160 : i32
    scf.if %140 {
      %c0_161 = arith.constant 0 : index
      %c0_162 = arith.constant 0 : index
      %c0_163 = arith.constant 0 : index
      %c0_164 = arith.constant 0 : index
      %141 = vector.load %arg6[%c0_161, %c0_162, %c0_163, %c0_164] : memref<1x1x2x128xf32, #tpu.memory_space<vmem>>, vector<1x1x2x128xf32>
      %142 = vector.shape_cast %141 : vector<1x1x2x128xf32> to vector<2x128xf32>
      %143 = arith.addf %142, %134 : vector<2x128xf32>
      %c0_165 = arith.constant 0 : index
      %c0_166 = arith.constant 0 : index
      %c0_167 = arith.constant 0 : index
      %c0_168 = arith.constant 0 : index
      %144 = vector.load %arg6[%c0_165, %c0_166, %c0_167, %c0_168] : memref<1x1x2x128xf32, #tpu.memory_space<vmem>>, vector<1x1x2x128xf32>
      %145 = vector.shape_cast %144 : vector<1x1x2x128xf32> to vector<2x128xf32>
      %146 = vector.shape_cast %143 : vector<2x128xf32> to vector<1x1x2x128xf32>
      tpu.vector_store %arg6[%c0_165, %c0_166, %c0_167, %c0_168], %146 {strides = array<i32>} : memref<1x1x2x128xf32, #tpu.memory_space<vmem>>, vector<1x1x2x128xf32>,
    } else {
    }
    return
  }
  func.func @transform_0(%arg0: i32, %arg1: i32, %arg2: i32) -> (i32, i32, i32, i32) {
    %c2_i32 = arith.constant 2 : i32
    %0 = arith.muli %arg1, %c2_i32 : i32
    %1 = arith.addi %0, %arg2 : i32
    %c0_i32 = arith.constant 0 : i32
    %c0_i32_0 = arith.constant 0 : i32
    %c0_i32_1 = arith.constant 0 : i32
    return %arg0, %c0_i32, %1, %c0_i32_0 : i32, i32, i32, i32
  }
  func.func @transform_1(%arg0: i32, %arg1: i32, %arg2: i32) -> (i32, i32, i32, i32) {
    %c0_i32 = arith.constant 0 : i32
    %c0_i32_0 = arith.constant 0 : i32
    %c0_i32_1 = arith.constant 0 : i32
    %c0_i32_2 = arith.constant 0 : i32
    %c0_i32_3 = arith.constant 0 : i32
    return %c0_i32, %c0_i32_0, %c0_i32_1, %c0_i32_2 : i32, i32, i32, i32
  }
  func.func @transform_2(%arg0: i32, %arg1: i32, %arg2: i32) -> (i32, i32, i32, i32) {
    %c2_i32 = arith.constant 2 : i32
    %0 = arith.muli %arg1, %c2_i32 : i32
    %1 = arith.addi %0, %arg2 : i32
    %c0_i32 = arith.constant 0 : i32
    %c0_i32_0 = arith.constant 0 : i32
    %c0_i32_1 = arith.constant 0 : i32
    return %arg0, %c0_i32, %1, %c0_i32_0 : i32, i32, i32, i32
  }
  func.func @transform_3(%arg0: i32, %arg1: i32, %arg2: i32) -> (i32, i32, i32, i32) {
    %c0_i32 = arith.constant 0 : i32
    %c0_i32_0 = arith.constant 0 : i32
    %c0_i32_1 = arith.constant 0 : i32
    return %arg0, %arg1, %c0_i32, %c0_i32_0 : i32, i32, i32, i32
  }
}

</mosaic_0001>

<bundles_post_ra>
// kernel: unet_upsample.3
= control target key start
LH: loop header
LB: loop body
LE: loop exit
PB: predicated region body
PF: predicated region fallthrough
CT: control target
= control target key end

     0   :  { %s624_s9 = smov 0   ;;  %s626_s10 = smov 0   ;;  %s721_s0 = inlined_call_operand.vmem [shape: bf16[2,4,64,128], index: 0, kind: input, shape index: {}]   ;;  %s722_s1 = inlined_call_operand.vmem [shape: f32[2,2,2,128], index: 1, kind: input, shape index: {}]   ;;  %s723_s2 = inlined_call_operand.vmem [shape: f32[2,8,2,8,256], index: 2, kind: output, shape index: {}]  }
   0x1   :  { %s628_s11 = smov 0   ;;  %s630_s12 = smov 0  }
   0x2   :  { %s632_s13 = smov 0   ;;  %s634_s14 = smov 0  }
   0x3   :  { %s636_s15 = smov 0  }
   0x4 LB: > { %s21_s16 = sadd.s32 1, %s599_s13  ;;  %s24_s17 = sadd.s32 1, %s603_s14  ;;  %s607_s15 = sphi %s636_s15, %s12_s15   ;;  %s603_s14 = sphi %s634_s14, %s729_s14   ;;  %s599_s13 = sphi %s632_s13, %s728_s13   ;;  %s595_s12 = sphi %s630_s12, %s727_s12   ;;  %s591_s11 = sphi %s628_s11, %s726_s11   ;;  %s587_s10 = sphi %s626_s10, %s725_s10   ;;  %s583_s9 = sphi %s624_s9, %s724_s9  }
   0x5   : > { %p22_p0 = scmp.ge.s32.totalorder %s21_s16, 4  ;;  %p40_p1 = scmp.ne.s32.totalorder %s587_s10, %s583_s9 }
   0x6   : > { %p41_p2 = scmp.eq.s32.totalorder %s607_s15, 0  ;;  %s33_s21 = sadd.s32 1, %s587_s10 }
   0x7   : > { %s731_s16 = smov (%p22_p0, %s21_s16), 0  ;;  %s733_s17 = smov (!%p22_p0, %s24_s17), %s603_s14 }
   0x8   : > { %p42_p3 = por %p41_p2, %p40_p1  ;;  %p26_p4 = scmp.ge.s32.totalorder %s733_s17, 2 }
   0x9   : > { %s29_s18 = ssub.s32 %s599_s13, %s731_s16  ;;  %p456_p6 = scmp.ge.s32.totalorder %s607_s15, 8 }
   0xa   : > { %s735_s17 = smov (%p26_p4, %s733_s17), 0 }
   0xb   : > { %s28_s19 = ssub.s32 %s603_s14, %s735_s17  ;;  %120 = sbr.rel (%p456_p6) target bundleno = 27 (0x1b), region = 16 }
   0xc   : > { %s30_s20 = sor.u32 %s29_s18, %s28_s19 }
   0xd   : > { %p31_p5 = scmp.eq.s32.totalorder %s30_s20, 0 }
   0xf   : > { %s675_s22 = scalar_select %p31_p5, %s587_s10, %s33_s21  }
  0x10   : > { %123 = sbr.rel (!%p42_p3) target bundleno = 27 (0x1b), region = 20  ;;  %s125_s23 = sand.u32 (%p42_p3), 1, %s587_s10  }
  0x11   : > { %s458_s24 = sshll.u32 (%p42_p3), %s599_s13, 1  ;;  %s457_s25 = sshll.u32 (%p42_p3), %s125_s23, 5 }
  0x12   : > { %s459_s26 = sshll.u32 (%p42_p3), %s603_s14, 5  ;;  %s127_s4 = scalar_lea.vmem (%p42_p3), [#allocation2], %s457_s25 }
  0x13   : > { %s130_s27 = sadd.s32 (%p42_p3), %s459_s26, %s458_s24 }
  0x14   : > { %s460_s28 = sshll.u32 (%p42_p3), %s130_s27, 2 }
  0x15   : > { %s132_s3 = scalar_lea.vmem %s721_s0, %s460_s28 }
  0x16   : > { %v149_v0 = vld [vmem:[%s132_s3] sm:$0xff]  }
  0x17   : > { %v153_v1 = vld [vmem:[%s132_s3 + $0x20] sm:$0xff]   ;;  %150 = vst [vmem:[%s127_s4] sm:$0xff] %v149_v0  }
  0x18   : > { %v157_v2 = vld [vmem:[%s132_s3 + $0x40] sm:$0xff]   ;;  %154 = vst [vmem:[%s127_s4 + $0x8] sm:$0xff] %v153_v1  }
  0x19   : > { %158 = vst [vmem:[%s127_s4 + $0x10] sm:$0xff] %v157_v2   ;;  %v161_v3 = vld [vmem:[%s132_s3 + $0x60] sm:$0xff]  }
  0x1a   : > { %162 = vst [vmem:[%s127_s4 + $0x18] sm:$0xff] %v161_v3  }
  0x1b PF: > { %p461_p7 = scmp.ge.s32.totalorder %s607_s15, 1  ;;  %p211_p8 = scmp.lt.s32.totalorder %s607_s15, 9 }
  0x1d   : > { %p212_p9 = pnand %p461_p7, %p211_p8 }
  0x1e   : > { %p250_p10 = scmp.lt.s32.totalorder (!%p212_p9), %s595_s12, 1  ;;  %s218_s18 = sand.u32 (!%p212_p9), 1, %s583_s9  }
  0x1f   : > { %215 = sbr.rel (%p212_p9) target bundleno = 83 (0x53), region = 65  ;;  %s465_s19 = sshll.u32 (!%p212_p9), %s591_s11, 1 }
  0x20   : > { %s462_s20 = sshll.u32 (!%p212_p9), %s218_s18, 5  ;;  %p258_p11 = scmp.lt.s32.totalorder (!%p212_p9), %s465_s19, 7 }
  0x21   : > { %s220_s21 = scalar_lea.vmem (!%p212_p9), [#allocation2], %s462_s20 }
  0x24   : > { %s737_s12 = smov (!%p250_p10, %s595_s12), 1  ;;  %vm268_vm0 = vcmask 1041408   ;;  %v301_v15 = vlaneseq  ;;  %s739_s19 = smov (!%p258_p11, %s465_s19), 7  ;;  %v477_v17 = vld [vmem:[%s220_s21] sm:$0xff]   ;;  %v492_v18 = vld [vmem:[%s220_s21 + $0x8] sm:$0xff]   ;;  %v493_v20 = vld [vmem:[%s220_s21 + $0x10] sm:$0xff]  }
  0x25   : > { %s475_s5 = sshll.u32 %s737_s12, 2  ;;  %v494_v21 = vld [vmem:[%s220_s21 + $0x18] sm:$0xff]   ;;  %s466_s23 = sshll.u32 %s739_s19, 2  ;;  %v478_v22 = vunpack.c.l.bf16 %v477_v17  ;;  %v479_v23 = vunpack.c.h.bf16 %v477_v17  ;;  %v482_v24 = vunpack.c.l.bf16 %v492_v18  ;;  %v483_v26 = vunpack.c.h.bf16 %v492_v18 }
  0x26   : > { %s254_s8 = scalar_lea.vmem %s722_s1, %s475_s5  ;;  %v302_v16 = vshrl.u32 %v301_v15, 7  ;;  %s467_s24 = sshll.u32 %s737_s12, 5  ;;  %v486_v27 = vunpack.c.l.bf16 %v493_v20  ;;  %v487_v28 = vunpack.c.h.bf16 %v493_v20  ;;  %v490_v29 = vunpack.c.l.bf16 %v494_v21 }
  0x27   : > { %v266_v4 = vld [vmem:[%s254_s8] sm:$0x3]  ;;  %v267_v5 = vld [vmem:[%s254_s8 + $0x2] sm:$0x3]  ;;  %v491_v33 = vunpack.c.h.bf16 %v494_v21  ;;  %s262_s9 = sadd.s32 %s467_s24, %s466_s23 }
  0x28   : > { %v269_v6 = vsel %vm268_vm0, %v266_v4, 0.0  ;;  %v270_v7 = vsel %vm268_vm0, %v267_v5, 0.0  ;;  %v303_v19 = vsub.s32 1, %v302_v16  ;;  %v315_v32 = vsub.s32 0, %v302_v16  ;;  %s468_s11 = sshll.u32 %s262_s9, 3 }
  0x29   : > { %v271_v8 = vadd.f32 %v270_v7, %v269_v6  ;;  %s264_s26 = scalar_lea.vmem %s723_s2, %s468_s11 }
  0x2b   : > { %v272_v9 = vmul.f32 0.00390625, %v271_v8 }
  0x2d   : > { %v273_v10 = vmul.f32 %v272_v9, %v272_v9 }
  0x2f   : > { %v275_v11 = vrot.slane %v273_v10, 7 }
  0x31   : > { %v277_v12 = vsub.f32 %v272_v9, %v275_v11 }
  0x33   : > { %v278_v13 = vmax.f32 %v277_v12, 0.0 }
  0x35   : > { %v279_v14 = vadd.f32 1e-05, %v278_v13 }
  0x37   : > { %551 = vrsqrt.f32 %v279_v14 }
  0x44   : > { %v552_v25 = vpop.eup %551 }
  0x45   : > { %v282_v30 = vrot.slane %v552_v25, 1  ;;  %v304_v31 = vrot.slane %v552_v25, %v303_v19 }
  0x47   : > { %v284_v34 = vmul.f32 %v282_v30, %v272_v9  ;;  %v305_v35 = vmul.f32 %v478_v22, %v304_v31  ;;  %v306_v36 = vmul.f32 %v479_v23, %v304_v31  ;;  %v307_v37 = vmul.f32 %v482_v24, %v304_v31 }
  0x48   : > { %v308_v38 = vmul.f32 %v483_v26, %v304_v31  ;;  %v309_v39 = vmul.f32 %v486_v27, %v304_v31  ;;  %v310_v40 = vmul.f32 %v487_v28, %v304_v31  ;;  %v311_v41 = vmul.f32 %v490_v29, %v304_v31 }
  0x49   : > { %v316_v42 = vrot.slane %v284_v34, %v315_v32  ;;  %v312_v43 = vmul.f32 %v491_v33, %v304_v31 }
  0x4b   : > { %v317_v44 = vsub.f32 %v305_v35, %v316_v42  ;;  %v318_v45 = vsub.f32 %v306_v36, %v316_v42  ;;  %v319_v46 = vsub.f32 %v307_v37, %v316_v42  ;;  %v320_v47 = vsub.f32 %v308_v38, %v316_v42 }
  0x4c   : > { %v321_v48 = vsub.f32 %v309_v39, %v316_v42  ;;  %v322_v49 = vsub.f32 %v310_v40, %v316_v42  ;;  %v323_v50 = vsub.f32 %v311_v41, %v316_v42  ;;  %v324_v51 = vsub.f32 %v312_v43, %v316_v42 }
  0x4d   : > { %v325_v52 = vmax.f32 %v317_v44, 0.0  ;;  %v326_v53 = vmax.f32 %v318_v45, 0.0  ;;  %v327_v54 = vmax.f32 %v319_v46, 0.0  ;;  %v328_v55 = vmax.f32 %v320_v47, 0.0 }
  0x4e   : > { %v329_v56 = vmax.f32 %v321_v48, 0.0  ;;  %v330_v57 = vmax.f32 %v322_v49, 0.0  ;;  %v331_v58 = vmax.f32 %v323_v50, 0.0  ;;  %v332_v59 = vmax.f32 %v324_v51, 0.0 }
  0x4f   : > { %333 = vst [vmem:[%s264_s26] sm:$0xff] %v325_v52  ;;  %334 = vst [vmem:[%s264_s26 + $0x20] sm:$0xff] %v326_v53 }
  0x50   : > { %335 = vst [vmem:[%s264_s26 + $0x8] sm:$0xff] %v327_v54  ;;  %336 = vst [vmem:[%s264_s26 + $0x28] sm:$0xff] %v328_v55 }
  0x51   : > { %469 = vst [vmem:[%s264_s26 + $0x10] sm:$0xff] %v329_v56  ;;  %470 = vst [vmem:[%s264_s26 + $0x30] sm:$0xff] %v330_v57 }
  0x52   : > { %471 = vst [vmem:[%s264_s26 + $0x18] sm:$0xff] %v331_v58  ;;  %472 = vst [vmem:[%s264_s26 + $0x38] sm:$0xff] %v332_v59 }
  0x53 PF: > { %s12_s15 = sadd.s32 1, %s607_s15   ;;  %s724_s9 = smov %s587_s10 }
  0x54   : > { %p9_p12 = scmp.ge.s32.totalorder %s12_s15, 10   ;;  %s725_s10 = smov %s675_s22 }
  0x55   : > { %s726_s11 = smov %s599_s13  ;;  %s727_s12 = smov %s603_s14 }
  0x56   : > { %s728_s13 = smov %s731_s16  ;;  %s729_s14 = smov %s735_s17 }
  0x57   :  { %11 = sbr.rel (!%p9_p12) target bundleno = 4 (0x4), region = 108 }

// kernel: unet_upsample.2
= control target key start
LH: loop header
LB: loop body
LE: loop exit
PB: predicated region body
PF: predicated region fallthrough
CT: control target
= control target key end

     0   :  { %s2363_s0 = inlined_call_operand.vmem [shape: bf16[2,9,64,8], index: 0, kind: input, shape index: {}]   ;;  %s2364_s1 = inlined_call_operand.vmem [shape: bf16[4,4,8,128], index: 1, kind: input, shape index: {}]   ;;  %s2365_s2 = inlined_call_operand.vmem [shape: bf16[2,4,64,128], index: 2, kind: output, shape index: {0}]   ;;  %s2366_s3 = inlined_call_operand.vmem [shape: f32[2,2,2,128], index: 3, kind: output, shape index: {1}]  }
   0x1   :  { %2367 = sst [smem:[#allocation4_spill]] %s2363_s0 }
   0x2   :  { %s2063_s12 = smov 0   ;;  %s2065_s13 = smov 0  }
   0x3   :  { %s2067_s14 = smov 0   ;;  %s2069_s15 = smov 0  }
   0x4   :  { %s2071_s16 = smov 0   ;;  %s2073_s17 = smov 0  }
   0x5   :  { %s2075_s18 = smov 0   ;;  %s2077_s19 = smov 0  }
   0x6   :  { %s2079_s20 = smov 0  }
   0x7 LB: > { %s26_s21 = sadd.s32 1, %s2027_s17  ;;  %s29_s22 = sadd.s32 1, %s2031_s18  ;;  %s2039_s20 = sphi %s2079_s20, %s14_s20   ;;  %s2035_s19 = sphi %s2077_s19, %s2377_s19   ;;  %s2031_s18 = sphi %s2075_s18, %s2376_s18   ;;  %s2027_s17 = sphi %s2073_s17, %s2375_s17   ;;  %s2023_s16 = sphi %s2071_s16, %s2374_s16   ;;  %s2019_s15 = sphi %s2069_s15, %s2373_s15   ;;  %s2015_s14 = sphi %s2067_s14, %s2372_s14   ;;  %s2011_s13 = sphi %s2065_s13, %s2371_s13   ;;  %s2007_s12 = sphi %s2063_s12, %s2370_s12  }
   0x8   : > { %p27_p0 = scmp.ge.s32.totalorder %s26_s21, 2  ;;  %s1602_s23 = sadd.s32 4294967295, %s2039_s20  }
   0x9   : > { %s1604_s24 = sshll.u32 %s2031_s18, 1  ;;  %s33_s25 = sadd.s32 1, %s2035_s19 }
   0xa   : > { %s2379_s21 = smov (%p27_p0, %s26_s21), 0  ;;  %s2381_s22 = smov (!%p27_p0, %s29_s22), %s2031_s18 }
   0xb   : > { %s38_s26 = sadd.s32 %s2027_s17, %s1604_s24  ;;  %p31_p1 = scmp.ge.s32.totalorder %s2381_s22, 2 }
   0xc   : > { %p53_p2 = scmp.ne.s32.totalorder %s2011_s13, %s2007_s12  ;;  %p54_p3 = scmp.eq.s32.totalorder %s2039_s20, 0 }
   0xd   : > { %p110_p4 = scmp.eq.s32.totalorder %s1602_s23, 7  ;;  %s2383_s22 = smov (%p31_p1, %s2381_s22), 0 }
   0xe   : > { %s2385_s25 = smov (!%p31_p1, %s33_s25), %s2035_s19  ;;  %s1605_s27 = sshll.u32 %s2383_s22, 1 }
   0xf   : > { %p55_p5 = por %p54_p3, %p53_p2  ;;  %p35_p6 = scmp.ge.s32.totalorder %s2385_s25, 2 }
  0x10   : > { %s40_s28 = sadd.s32 %s1605_s27, %s2379_s21  ;;  %p2125_p7 = por %p110_p4, %p53_p2 }
  0x11   : > { %s42_s29 = ssub.s32 %s38_s26, %s40_s28  ;;  %s2387_s25 = smov (%p35_p6, %s2385_s25), 0 }
  0x12   : > { %s41_s4 = ssub.s32 %s2035_s19, %s2387_s25  ;;  %s46_s6 = sadd.s32 1, %s2011_s13 }
  0x13   : > { %s43_s5 = sor.u32 %s42_s29, %s41_s4  ;;  %p1609_p9 = scmp.ge.s32.totalorder %s2039_s20, 8 }
  0x14   : > { %p44_p8 = scmp.eq.s32.totalorder %s43_s5, 0 }
  0x15   : > { %163 = sbr.rel (%p1609_p9) target bundleno = 45 (0x2d), region = 20 }
  0x16   : > { %s2135_s7 = scalar_select %p44_p8, %s2011_s13, %s46_s6  }
  0x1a   : > { %166 = sbr.rel (!%p55_p5) target bundleno = 45 (0x2d), region = 24  ;;  %s168_s8 = sand.u32 (%p55_p5), 1, %s2011_s13  }
  0x1b   : > { %s1876_s9 = smul.u32 (%p55_p5), 72, %s168_s8  ;;  %s1611_s10 = sshll.u32 (%p55_p5), %s38_s26, 1 }
  0x1c   : > { %s1877_s11 = smul.u32 (%p55_p5), 72, %s2035_s19  ;;  %s2369_s0 = sld [smem:[#allocation4_spill]] (%p55_p5) }
  0x1d   : > { %s170_s4 = scalar_lea.vmem (%p55_p5), [#allocation2], %s1876_s9 }
  0x1e   : > { %s175_s23 = sadd.s32 (%p55_p5), %s1877_s11, %s1611_s10 }
  0x1f   : > { %s1612_s24 = sshll.u32 %s175_s23, 2 }
  0x22   : > { %s177_s29 = scalar_lea.vmem %s2369_s0, %s1612_s24 }
  0x23   : > { %v194_v0 = vld [vmem:[%s177_s29] sm:$0xff]  }
  0x24   : > { %v198_v1 = vld [vmem:[%s177_s29 + $0x20] sm:$0xff]   ;;  %195 = vst [vmem:[%s170_s4] sm:$0xff] %v194_v0  }
  0x25   : > { %v202_v2 = vld [vmem:[%s177_s29 + $0x40] sm:$0xff]   ;;  %199 = vst [vmem:[%s170_s4 + $0x8] sm:$0xff] %v198_v1  }
  0x26   : > { %203 = vst [vmem:[%s170_s4 + $0x10] sm:$0xff] %v202_v2   ;;  %v206_v3 = vld [vmem:[%s177_s29 + $0x60] sm:$0xff]  }
  0x27   : > { %v210_v4 = vld [vmem:[%s177_s29 + $0x80] sm:$0xff]   ;;  %207 = vst [vmem:[%s170_s4 + $0x18] sm:$0xff] %v206_v3  }
  0x28   : > { %v214_v5 = vld [vmem:[%s177_s29 + $0xa0] sm:$0xff]   ;;  %211 = vst [vmem:[%s170_s4 + $0x20] sm:$0xff] %v210_v4  }
  0x29   : > { %215 = vst [vmem:[%s170_s4 + $0x28] sm:$0xff] %v214_v5   ;;  %v218_v6 = vld [vmem:[%s177_s29 + $0xc0] sm:$0xff]  }
  0x2a   : > { %v222_v7 = vld [vmem:[%s177_s29 + $0xe0] sm:$0xff]   ;;  %219 = vst [vmem:[%s170_s4 + $0x30] sm:$0xff] %v218_v6  }
  0x2b   : > { %v226_v8 = vld [vmem:[%s177_s29 + $0x100] sm:$0xff]   ;;  %223 = vst [vmem:[%s170_s4 + $0x38] sm:$0xff] %v222_v7  }
  0x2c   : > { %227 = vst [vmem:[%s170_s4 + $0x40] sm:$0xff] %v226_v8  }
  0x2d PF: > { %p1613_p10 = scmp.ge.s32.totalorder %s2039_s20, 1  ;;  %p288_p11 = scmp.lt.s32.totalorder %s2039_s20, 9 }
  0x2f   : > { %p289_p12 = pnand %p1613_p10, %p288_p11 }
  0x30   : > { %p331_p13 = scmp.lt.s32.totalorder (!%p289_p12), %s2023_s16, 1  ;;  %p333_p0 = scmp.lt.s32.totalorder (!%p289_p12), %s2019_s15, 1 }
  0x31   : > { %292 = sbr.rel (%p289_p12) target bundleno = 355 (0x163), region = 65  ;;  %s295_s9 = sand.u32 (!%p289_p12), 1, %s2007_s12  }
  0x32   : > { %s1878_s24 = smul.u32 (!%p289_p12), 72, %s295_s9  ;;  %p1708_p1 = scmp.ne.s32.totalorder (!%p289_p12), %s2015_s14, 0 }
  0x34   : > { %s2181_s0 = scalar_lea.vmem (!%p289_p12), [#allocation2], %s1878_s24 }
  0x36   : > { %v1621_v9 = vld [vmem:[%s2364_s1 + $0x4] sm:$0xf]  ;;  %vm358_vm0 = vcmask 1043456   ;;  %v2041_v10 = vmov 0.0   ;;  %v343_v12 = vld [vmem:[%s2364_s1] sm:$0xf] }
  0x37   : > { %1780 = vmatprep.subr.bf16.mxu0 %v2041_v10  ;;  %v360_v11 = vsel %vm358_vm0, %v1621_v9, 0  ;;  %1786 = vmatprep.subr.bf16.mxu1 %v2041_v10  ;;  %s332_s10 = scalar_select %p331_p13, %s2023_s16, 1  ;;  %v412_v13 = vsel %vm358_vm0, %v343_v12, 0  ;;  %vm2042_vm1 = vmmov 0   ;;  %v1628_v14 = vld [vmem:[%s2364_s1 + $0x8] sm:$0xf] }
  0x38   : > { %1781 = vmatpush3.bf16.msra.mxu0 %v360_v11  ;;  %1782 = vmatprep.mubr.msk.bf16.mxu0 %vm2042_vm1, %v2041_v10  ;;  %s334_s11 = scalar_select %p333_p0, %s2019_s15, 1  ;;  %v1631_v15 = vld [vmem:[%s2364_s1 + $0xc] sm:$0xf]  ;;  %vm354_vm2 = vcmask 64512   ;;  %v1953_v16 = vld [vmem:[%s2181_s0 + $0x18] sm:$0xff]   ;;  %v469_v17 = vsel %vm358_vm0, %v1628_v14, 0 }
  0x39   : > { %1787 = vmatpush3.bf16.msra.mxu1 %v412_v13  ;;  %1788 = vmatprep.mubr.msk.bf16.mxu1 %vm2042_vm1, %v2041_v10  ;;  %s1615_s23 = sshll.u32 %s332_s10, 1  ;;  %v1954_v18 = vld [vmem:[%s2181_s0 + $0x20] sm:$0xff]   ;;  %v527_v19 = vsel %vm358_vm0, %v1631_v15, 0  ;;  %v1641_v20 = vld [vmem:[%s2364_s1 + $0x14] sm:$0xf]  ;;  %v1961_v39 = vld [vmem:[%s2181_s0 + $0x18] sm:$0xff]  }
  0x3a   : > { %1792 = vmatprep.subr.bf16.mxu0 %v2041_v10  ;;  %1798 = vmatprep.subr.bf16.mxu1 %v2041_v10  ;;  %s336_s29 = sadd.s32 %s1615_s23, %s334_s11  ;;  %v1638_v21 = vld [vmem:[%s2364_s1 + $0x10] sm:$0xf]  ;;  %v1956_v23 = vld [vmem:[%s2181_s0] sm:$0xff]   ;;  %v616_v24 = vsel %vm358_vm0, %v1641_v20, 0  ;;  %v1648_v26 = vld [vmem:[%s2364_s1 + $0x18] sm:$0xf] }
  0x3b   : > { %s1616_s5 = sshll.u32 %s336_s29, 1  ;;  %1783 = vmatmul.mubr.msk.bf16.vlgmr.msra.gmra.mxu0 %vm354_vm2, %v1953_v16  ;;  %v1955_v22 = vld [vmem:[%s2181_s0 + $0x8] sm:$0xff]   ;;  %v668_v25 = vsel %vm358_vm0, %v1638_v21, 0  ;;  %v1653_v27 = vld [vmem:[%s2364_s1 + $0x1c] sm:$0xf]  ;;  %v1958_v29 = vld [vmem:[%s2181_s0 + $0x20] sm:$0xff]  }
  0x3c   : > { %s2179_s10 = scalar_lea.vmem %s2366_s3, %s1616_s5  ;;  %1789 = vmatmul.mubr.msk.bf16.vlgmr.msra.gmra.mxu1 %vm354_vm2, %v1954_v18  ;;  %1793 = vmatpush3.bf16.msra.mxu0 %v469_v17  ;;  %v1957_v28 = vld [vmem:[%s2181_s0 + $0x28] sm:$0xff]   ;;  %v724_v30 = vsel %vm358_vm0, %v1648_v26, 0  ;;  %v783_v31 = vsel %vm358_vm0, %v1653_v27, 0  ;;  %v1665_v32 = vld [vmem:[%s2364_s1 + $0x24] sm:$0xf]  ;;  %v1960_v35 = vld [vmem:[%s2181_s0 + $0x10] sm:$0xff]  }
  0x3d   : > { %1799 = vmatpush3.bf16.msra.mxu1 %v527_v19  ;;  %1794 = vmatprep.mubr.msk.bf16.mxu0 %vm2042_vm1, %v2041_v10  ;;  %v1959_v33 = vld [vmem:[%s2181_s0 + $0x8] sm:$0xff]   ;;  %v1662_v34 = vld [vmem:[%s2364_s1 + $0x20] sm:$0xf]  ;;  %v874_v36 = vsel %vm358_vm0, %v1665_v32, 0  ;;  %v1964_v47 = vld [vmem:[%s2181_s0 + $0x30] sm:$0xff]   ;;  %vm1374_vm3 = vcmask 1040384  }
  0x3e   : > { %1800 = vmatprep.mubr.msk.bf16.mxu1 %vm2042_vm1, %v2041_v10  ;;  %1804 = vmatprep.subr.bf16.mxu0 %v2041_v10  ;;  %v926_v37 = vsel %vm358_vm0, %v1662_v34, 0  ;;  %v1672_v38 = vld [vmem:[%s2364_s1 + $0x28] sm:$0xf]  ;;  %v1677_v40 = vld [vmem:[%s2364_s1 + $0x2c] sm:$0xf]  ;;  %v1963_v45 = vld [vmem:[%s2181_s0 + $0x38] sm:$0xff]  }
  0x3f   : > { %1810 = vmatprep.subr.bf16.mxu1 %v2041_v10  ;;  %v1962_v41 = vld [vmem:[%s2181_s0 + $0x20] sm:$0xff]   ;;  %v983_v42 = vsel %vm358_vm0, %v1672_v38, 0  ;;  %v1042_v43 = vsel %vm358_vm0, %v1677_v40, 0  ;;  %v1689_v44 = vld [vmem:[%s2364_s1 + $0x34] sm:$0xf]  ;;  %v1967_v56 = vld [vmem:[%s2181_s0 + $0x38] sm:$0xff]  }
  0x40   : > { %v1686_v46 = vld [vmem:[%s2364_s1 + $0x30] sm:$0xf]  ;;  %v1133_v48 = vsel %vm358_vm0, %v1689_v44, 0  ;;  %v1696_v50 = vld [vmem:[%s2364_s1 + $0x38] sm:$0xf]  ;;  %v1966_v53 = vld [vmem:[%s2181_s0 + $0x20] sm:$0xff]  }
  0x41   : > { %v1185_v49 = vsel %vm358_vm0, %v1686_v46, 0  ;;  %v1965_v51 = vld [vmem:[%s2181_s0 + $0x28] sm:$0xff]   ;;  %v1701_v52 = vld [vmem:[%s2364_s1 + $0x3c] sm:$0xf]  ;;  %v1241_v54 = vsel %vm358_vm0, %v1696_v50, 0  ;;  %v1968_v57 = vld [vmem:[%s2181_s0 + $0x40] sm:$0xff]  }
  0x42   : > { %v1300_v55 = vsel %vm358_vm0, %v1701_v52, 0  ;;  %s1614_s0 = sshll.u32 %s295_s9, 5 }
  0x43   : > { %1795 = vmatmul.mubr.msk.bf16.vlgmr.msra.gmra.mxu0 %vm354_vm2, %v1955_v22  ;;  %s2310_s24 = scalar_lea.vmem [#allocation3], %s1614_s0 }
  0x44   : > { %1801 = vmatmul.mubr.msk.bf16.vlgmr.msra.gmra.mxu1 %vm354_vm2, %v1956_v23  ;;  %1805 = vmatpush3.bf16.msra.mxu0 %v616_v24 }
  0x45   : > { %1811 = vmatpush3.bf16.msra.mxu1 %v668_v25  ;;  %1806 = vmatprep.mubr.msk.bf16.mxu0 %vm2042_vm1, %v2041_v10 }
  0x46   : > { %1812 = vmatprep.mubr.msk.bf16.mxu1 %vm2042_vm1, %v2041_v10  ;;  %1816 = vmatprep.subr.bf16.mxu0 %v2041_v10 }
  0x47   : > { %1822 = vmatprep.subr.bf16.mxu1 %v2041_v10 }
  0x4b   : > { %1807 = vmatmul.mubr.msk.bf16.vlgmr.msra.gmra.mxu0 %vm354_vm2, %v1957_v28 }
  0x4c   : > { %1813 = vmatmul.mubr.msk.bf16.vlgmr.msra.gmra.mxu1 %vm354_vm2, %v1958_v29  ;;  %1817 = vmatpush3.bf16.msra.mxu0 %v724_v30 }
  0x4d   : > { %1823 = vmatpush3.bf16.msra.mxu1 %v783_v31  ;;  %1818 = vmatprep.mubr.msk.bf16.mxu0 %vm2042_vm1, %v2041_v10 }
  0x4e   : > { %1824 = vmatprep.mubr.msk.bf16.mxu1 %vm2042_vm1, %v2041_v10  ;;  %1828 = vmatprep.subr.bf16.mxu0 %v2041_v10 }
  0x4f   : > { %1834 = vmatprep.subr.bf16.mxu1 %v2041_v10 }
  0x53   : > { %1819 = vmatmul.mubr.msk.bf16.vlgmr.msra.gmra.mxu0 %vm354_vm2, %v1959_v33 }
  0x54   : > { %1825 = vmatmul.mubr.msk.bf16.vlgmr.msra.gmra.mxu1 %vm354_vm2, %v1960_v35  ;;  %1829 = vmatpush3.bf16.msra.mxu0 %v874_v36 }
  0x55   : > { %1835 = vmatpush3.bf16.msra.mxu1 %v926_v37  ;;  %1830 = vmatprep.mubr.msk.bf16.mxu0 %vm2042_vm1, %v2041_v10 }
  0x56   : > { %1836 = vmatprep.mubr.msk.bf16.mxu1 %vm2042_vm1, %v2041_v10  ;;  %1840 = vmatprep.subr.bf16.mxu0 %v2041_v10 }
  0x57   : > { %1846 = vmatprep.subr.bf16.mxu1 %v2041_v10 }
  0x5b   : > { %1831 = vmatmul.mubr.msk.bf16.vlgmr.msra.gmra.mxu0 %vm354_vm2, %v1961_v39 }
  0x5c   : > { %1837 = vmatmul.mubr.msk.bf16.vlgmr.msra.gmra.mxu1 %vm354_vm2, %v1962_v41  ;;  %1841 = vmatpush3.bf16.msra.mxu0 %v983_v42 }
  0x5d   : > { %1847 = vmatpush3.bf16.msra.mxu1 %v1042_v43  ;;  %1842 = vmatprep.mubr.msk.bf16.mxu0 %vm2042_vm1, %v2041_v10 }
  0x5e   : > { %1848 = vmatprep.mubr.msk.bf16.mxu1 %vm2042_vm1, %v2041_v10  ;;  %1852 = vmatprep.subr.bf16.mxu0 %v2041_v10 }
  0x5f   : > { %1858 = vmatprep.subr.bf16.mxu1 %v2041_v10 }
  0x63   : > { %1843 = vmatmul.mubr.msk.bf16.vlgmr.msra.gmra.mxu0 %vm354_vm2, %v1963_v45 }
  0x64   : > { %1849 = vmatmul.mubr.msk.bf16.vlgmr.msra.gmra.mxu1 %vm354_vm2, %v1964_v47  ;;  %1853 = vmatpush3.bf16.msra.mxu0 %v1133_v48 }
  0x65   : > { %1859 = vmatpush3.bf16.msra.mxu1 %v1185_v49  ;;  %1854 = vmatprep.mubr.msk.bf16.mxu0 %vm2042_vm1, %v2041_v10 }
  0x66   : > { %1860 = vmatprep.mubr.msk.bf16.mxu1 %vm2042_vm1, %v2041_v10  ;;  %1864 = vmatprep.subr.bf16.mxu0 %v2041_v10 }
  0x67   : > { %1870 = vmatprep.subr.bf16.mxu1 %v2041_v10 }
  0x6b   : > { %1855 = vmatmul.mubr.msk.bf16.vlgmr.msra.gmra.mxu0 %vm354_vm2, %v1965_v51 }
  0x6c   : > { %1861 = vmatmul.mubr.msk.bf16.vlgmr.msra.gmra.mxu1 %vm354_vm2, %v1966_v53  ;;  %1865 = vmatpush3.bf16.msra.mxu0 %v1241_v54 }
  0x6d   : > { %1871 = vmatpush3.bf16.msra.mxu1 %v1300_v55  ;;  %1866 = vmatprep.mubr.msk.bf16.mxu0 %vm2042_vm1, %v2041_v10 }
  0x6e   : > { %1872 = vmatprep.mubr.msk.bf16.mxu1 %vm2042_vm1, %v2041_v10 }
  0x73   : > { %1867 = vmatmul.mubr.msk.bf16.vlgmr.msra.gmra.mxu0 %vm354_vm2, %v1967_v56 }
  0x74   : > { %1873 = vmatmul.mubr.msk.bf16.vlgmr.msra.gmra.mxu1 %vm354_vm2, %v1968_v57 }
  0xfb   : > { %v396_v58 = vpop.f32.mrf.mxu0 }
  0xfc   : > { %v448_v59 = vpop.f32.mrf.mxu1 }
  0xfd   : > { %v1784_v60 = vpop.f32.mrf.mxu0  ;;  %v449_v3 = vadd.f32 %v448_v59, %v396_v58 }
  0xfe   : > { %v1790_v61 = vpop.f32.mrf.mxu1 }
  0xff   : > { %v399_v62 = vpop.f32.mrf.mxu0 }
 0x100   : > { %v451_v63 = vpop.f32.mrf.mxu1 }
 0x101   : > { %v1785_v0 = vpop.f32.mrf.mxu0  ;;  %v452_v6 = vadd.f32 %v451_v63, %v399_v62 }
 0x102   : > { %v1791_v1 = vpop.f32.mrf.mxu1 }
 0x103   : > { %v505_v2 = vpop.f32.mrf.mxu0 }
 0x104   : > { %v563_v4 = vpop.f32.mrf.mxu1  ;;  %v512_v7 = vadd.f32 %v505_v2, %v449_v3 }
 0x105   : > { %v1796_v5 = vpop.f32.mrf.mxu0 }
 0x106   : > { %v1802_v8 = vpop.f32.mrf.mxu1  ;;  %v2307_v13 = vadd.f32 %v563_v4, %v512_v7 }
 0x107   : > { %v508_v9 = vpop.f32.mrf.mxu0 }
 0x108   : > { %v513_v10 = vadd.f32 %v508_v9, %v452_v6  ;;  %v566_v11 = vpop.f32.mrf.mxu1  ;;  %v589_v1 = vmul.f32 %v2307_v13, %v2307_v13 }
 0x109   : > { %v1797_v12 = vpop.f32.mrf.mxu0 }
 0x10a   : > { %v571_v14 = vadd.f32 %v566_v11, %v513_v10  ;;  %v1803_v15 = vpop.f32.mrf.mxu1 }
 0x10b   : > { %v652_v16 = vpop.f32.mrf.mxu0 }
 0x10c   : > { %v1728_v17 = vpack.c.bf16 %v571_v14, %v2307_v13  ;;  %v704_v18 = vpop.f32.mrf.mxu1  ;;  %v590_v60 = vmul.f32 %v571_v14, %v571_v14  ;;  %v582_v9 = vadd.f32 %v571_v14, %v2307_v13 }
 0x10d   : > { %v1808_v19 = vpop.f32.mrf.mxu0  ;;  %v705_v26 = vadd.f32 %v704_v18, %v652_v16 }
 0x10e   : > { %1729 = vst [vmem:[%s2310_s24] sm:$0xff] %v1728_v17   ;;  %v1814_v20 = vpop.f32.mrf.mxu1  ;;  %v591_v10 = vadd.f32 %v590_v60, %v589_v1 }
 0x10f   : > { %v655_v21 = vpop.f32.mrf.mxu0 }
 0x110   : > { %v707_v22 = vpop.f32.mrf.mxu1 }
 0x111   : > { %v1809_v23 = vpop.f32.mrf.mxu0  ;;  %v708_v29 = vadd.f32 %v707_v22, %v655_v21  ;;  %v583_v21 = vrot.slane %v582_v9, 4  ;;  %v592_v22 = vrot.slane %v591_v10, 4 }
 0x112   : > { %v1815_v24 = vpop.f32.mrf.mxu1 }
 0x113   : > { %v760_v25 = vpop.f32.mrf.mxu0 }
 0x114   : > { %v819_v27 = vpop.f32.mrf.mxu1  ;;  %v767_v30 = vadd.f32 %v760_v25, %v705_v26 }
 0x115   : > { %v1820_v28 = vpop.f32.mrf.mxu0 }
 0x116   : > { %v1826_v31 = vpop.f32.mrf.mxu1  ;;  %v826_v36 = vadd.f32 %v819_v27, %v767_v30 }
 0x117   : > { %v763_v32 = vpop.f32.mrf.mxu0  ;;  %v584_v31 = vadd.f32 %v583_v21, %v582_v9 }
 0x118   : > { %v768_v33 = vadd.f32 %v763_v32, %v708_v29  ;;  %v822_v34 = vpop.f32.mrf.mxu1  ;;  %v846_v61 = vmul.f32 %v826_v36, %v826_v36  ;;  %v593_v32 = vadd.f32 %v592_v22, %v591_v10 }
 0x119   : > { %v1821_v35 = vpop.f32.mrf.mxu0 }
 0x11a   : > { %v827_v37 = vadd.f32 %v822_v34, %v768_v33  ;;  %v1827_v38 = vpop.f32.mrf.mxu1 }
 0x11b   : > { %v910_v39 = vpop.f32.mrf.mxu0 }
 0x11c   : > { %v1733_v40 = vpack.c.bf16 %v827_v37, %v826_v36  ;;  %v962_v41 = vpop.f32.mrf.mxu1  ;;  %v847_v55 = vmul.f32 %v827_v37, %v827_v37  ;;  %v839_v2 = vadd.f32 %v827_v37, %v826_v36 }
 0x11d   : > { %v1832_v42 = vpop.f32.mrf.mxu0  ;;  %v963_v47 = vadd.f32 %v962_v41, %v910_v39 }
 0x11e   : > { %1745 = vst [vmem:[%s2310_s24 + $0x8] sm:$0xff] %v1733_v40   ;;  %v1838_v43 = vpop.f32.mrf.mxu1  ;;  %v848_v3 = vadd.f32 %v847_v55, %v846_v61  ;;  %v840_v17 = vrot.slane %v839_v2, 4 }
 0x11f   : > { %v913_v44 = vpop.f32.mrf.mxu0 }
 0x120   : > { %v965_v45 = vpop.f32.mrf.mxu1  ;;  %v849_v18 = vrot.slane %v848_v3, 4  ;;  %v841_v28 = vadd.f32 %v840_v17, %v839_v2 }
 0x121   : > { %v1833_v46 = vpop.f32.mrf.mxu0  ;;  %v966_v53 = vadd.f32 %v965_v45, %v913_v44  ;;  %v585_v44 = vrot.slane %v584_v31, 2  ;;  %v594_v45 = vrot.slane %v593_v32, 2 }
 0x122   : > { %v1839_v48 = vpop.f32.mrf.mxu1  ;;  %v850_v29 = vadd.f32 %v849_v18, %v848_v3  ;;  %v842_v38 = vrot.slane %v841_v28, 2 }
 0x123   : > { %v1019_v49 = vpop.f32.mrf.mxu0 }
 0x124   : > { %v1026_v50 = vadd.f32 %v1019_v49, %v963_v47  ;;  %v1078_v51 = vpop.f32.mrf.mxu1  ;;  %v851_v39 = vrot.slane %v850_v29, 2 }
 0x125   : > { %v1844_v52 = vpop.f32.mrf.mxu0 }
 0x126   : > { %v1850_v54 = vpop.f32.mrf.mxu1  ;;  %v1085_v57 = vadd.f32 %v1078_v51, %v1026_v50  ;;  %v843_v51 = vadd.f32 %v842_v38, %v841_v28  ;;  %v852_v52 = vadd.f32 %v851_v39, %v850_v29 }
 0x127   : > { %v1022_v56 = vpop.f32.mrf.mxu0 }
 0x128   : > { %v1027_v58 = vadd.f32 %v1022_v56, %v966_v53  ;;  %v1081_v59 = vpop.f32.mrf.mxu1  ;;  %v1105_v5 = vmul.f32 %v1085_v57, %v1085_v57 }
 0x129   : > { %v1845_v62 = vpop.f32.mrf.mxu0 }
 0x12a   : > { %v1086_v63 = vadd.f32 %v1081_v59, %v1027_v58  ;;  %v1851_v0 = vpop.f32.mrf.mxu1  ;;  %v595_v58 = vadd.f32 %v594_v45, %v593_v32 }
 0x12b   : > { %v1169_v4 = vpop.f32.mrf.mxu0  ;;  %v853_v0 = vrot.slane %v852_v52, 1 }
 0x12c   : > { %v1738_v6 = vpack.c.bf16 %v1086_v63, %v1085_v57  ;;  %v1106_v7 = vmul.f32 %v1086_v63, %v1086_v63  ;;  %v1221_v8 = vpop.f32.mrf.mxu1  ;;  %v1098_v12 = vadd.f32 %v1086_v63, %v1085_v57  ;;  %v586_v57 = vadd.f32 %v585_v44, %v584_v31 }
 0x12d   : > { %v1856_v11 = vpop.f32.mrf.mxu0  ;;  %v1222_v26 = vadd.f32 %v1221_v8, %v1169_v4  ;;  %v844_v63 = vrot.slane %v843_v51, 1  ;;  %v596_v4 = vrot.slane %v595_v58, 1  ;;  %v854_v10 = vadd.f32 %v853_v0, %v852_v52 }
 0x12e   : > { %1746 = vst [vmem:[%s2310_s24 + $0x10] sm:$0xff] %v1738_v6   ;;  %v1107_v15 = vadd.f32 %v1106_v7, %v1105_v5  ;;  %v1862_v16 = vpop.f32.mrf.mxu1  ;;  %v1099_v24 = vrot.slane %v1098_v12, 4  ;;  %v587_v3 = vrot.slane %v586_v57, 1 }
 0x12f   : > { %v1172_v19 = vpop.f32.mrf.mxu0  ;;  %v845_v9 = vadd.f32 %v844_v63, %v843_v51  ;;  %v597_v16 = vadd.f32 %v596_v4, %v595_v58 }
 0x130   : > { %v1224_v20 = vpop.f32.mrf.mxu1  ;;  %v1108_v25 = vrot.slane %v1107_v15, 4  ;;  %v1100_v34 = vadd.f32 %v1099_v24, %v1098_v12 }
 0x131   : > { %v1857_v23 = vpop.f32.mrf.mxu0  ;;  %v1225_v36 = vadd.f32 %v1224_v20, %v1172_v19  ;;  %v856_v22 = vadd.f32 %v854_v10, %v597_v16 }
 0x132   : > { %v1863_v27 = vpop.f32.mrf.mxu1  ;;  %v1109_v35 = vadd.f32 %v1108_v25, %v1107_v15  ;;  %v1101_v47 = vrot.slane %v1100_v34, 2  ;;  %v588_v15 = vadd.f32 %v587_v3, %v586_v57 }
 0x133   : > { %v1277_v13 = vpop.f32.mrf.mxu0 }
 0x134   : > { %v1284_v14 = vadd.f32 %v1277_v13, %v1222_v26  ;;  %v1336_v30 = vpop.f32.mrf.mxu1  ;;  %v1110_v48 = vrot.slane %v1109_v35, 2  ;;  %v1102_v59 = vadd.f32 %v1101_v47, %v1100_v34  ;;  %v855_v21 = vadd.f32 %v845_v9, %v588_v15 }
 0x135   : > { %v1868_v33 = vpop.f32.mrf.mxu0 }
 0x136   : > { %v1874_v37 = vpop.f32.mrf.mxu1  ;;  %v1343_v41 = vadd.f32 %v1336_v30, %v1284_v14  ;;  %v1111_v60 = vadd.f32 %v1110_v48, %v1109_v35  ;;  %v1103_v5 = vrot.slane %v1102_v59, 1 }
 0x137   : > { %v1280_v40 = vpop.f32.mrf.mxu0 }
 0x138   : > { %v1285_v42 = vadd.f32 %v1280_v40, %v1225_v36  ;;  %v1339_v43 = vpop.f32.mrf.mxu1  ;;  %v1363_v53 = vmul.f32 %v1343_v41, %v1343_v41  ;;  %v1112_v6 = vrot.slane %v1111_v60, 1  ;;  %v1104_v17 = vadd.f32 %v1103_v5, %v1102_v59 }
 0x139   : > { %v1869_v46 = vpop.f32.mrf.mxu0 }
 0x13a   : > { %v1344_v49 = vadd.f32 %v1339_v43, %v1285_v42  ;;  %v1875_v50 = vpop.f32.mrf.mxu1  ;;  %v1113_v18 = vadd.f32 %v1112_v6, %v1111_v60  ;;  %v1114_v25 = vadd.f32 %v1104_v17, %v855_v21 }
 0x13c   : > { %v1743_v54 = vpack.c.bf16 %v1344_v49, %v1343_v41  ;;  %v1356_v55 = vadd.f32 %v1344_v49, %v1343_v41  ;;  %v1364_v56 = vmul.f32 %v1344_v49, %v1344_v49  ;;  %v1115_v26 = vadd.f32 %v1113_v18, %v856_v22 }
 0x13e   : > { %1747 = vst [vmem:[%s2310_s24 + $0x18] sm:$0xff] %v1743_v54   ;;  %v1357_v61 = vrot.slane %v1356_v55, 4  ;;  %v1365_v62 = vadd.f32 %v1364_v56, %v1363_v53 }
 0x140   : > { %v1358_v1 = vadd.f32 %v1357_v61, %v1356_v55  ;;  %v1366_v2 = vrot.slane %v1365_v62, 4 }
 0x142   : > { %v1359_v7 = vrot.slane %v1358_v1, 2  ;;  %v1367_v8 = vadd.f32 %v1366_v2, %v1365_v62 }
 0x144   : > { %v1360_v11 = vadd.f32 %v1359_v7, %v1358_v1  ;;  %v1368_v12 = vrot.slane %v1367_v8, 2 }
 0x146   : > { %v1361_v19 = vrot.slane %v1360_v11, 1  ;;  %v1369_v20 = vadd.f32 %v1368_v12, %v1367_v8 }
 0x148   : > { %v1362_v23 = vadd.f32 %v1361_v19, %v1360_v11  ;;  %v1370_v24 = vrot.slane %v1369_v20, 1 }
 0x14a   : > { %v1371_v27 = vadd.f32 %v1370_v24, %v1369_v20  ;;  %v1372_v28 = vadd.f32 %v1362_v23, %v1114_v25  ;;  %1379 = sbr.rel (%p1708_p1) target bundleno = 336 (0x150), region = 73 }
 0x14c   : > { %v1373_v29 = vadd.f32 %v1371_v27, %v1115_v26 }
 0x14e   : > { %v1375_v13 = vsel %vm1374_vm3, %v1372_v28, %v1373_v29 }
 0x14f   : > { %1380 = vst [vmem:[%s2179_s10] sm:$0x3] %v1375_v13 }
 0x150 PF: > { %p1709_p2 = scmp.le.s32.totalorder %s2015_s14, 0 }
 0x152   : > { %1384 = sbr.rel (%p1709_p2) target bundleno = 347 (0x15b), region = 77 }
 0x157   : > { %v1385_v14 = vld [vmem:[%s2179_s10] sm:$0x3] }
 0x158   : > { %v1386_v30 = vadd.f32 %v1385_v14, %v1375_v13 }
 0x15a   : > { %1387 = vst [vmem:[%s2179_s10] sm:$0x3] %v1386_v30 }
 0x15b PF: > { %1402 = sbr.rel (!%p2125_p7) target bundleno = 355 (0x163), region = 81  ;;  %s1711_s12 = sshll.u32 (%p2125_p7), %s2019_s15, 1  ;;  %v1426_v31 = vld [vmem:[%s2310_s24] sm:$0xff] (%p2125_p7)   ;;  %v1430_v32 = vld [vmem:[%s2310_s24 + $0x8] sm:$0xff] (%p2125_p7)   ;;  %v1434_v33 = vld [vmem:[%s2310_s24 + $0x10] sm:$0xff] (%p2125_p7)  }
 0x15c   : > { %s1713_s9 = sshll.u32 (%p2125_p7), %s2023_s16, 5  ;;  %s1404_s27 = sadd.s32 (%p2125_p7), %s2015_s14, %s1711_s12  ;;  %v1438_v34 = vld [vmem:[%s2310_s24 + $0x18] sm:$0xff] (%p2125_p7)  }
 0x15d   : > { %s1712_s28 = sshll.u32 (%p2125_p7), %s1404_s27, 1 }
 0x15e   : > { %s1407_s29 = sadd.s32 (%p2125_p7), %s1713_s9, %s1712_s28 }
 0x15f   : > { %s1714_s10 = sshll.u32 (%p2125_p7), %s1407_s29, 2 }
 0x160   : > { %s1409_s26 = scalar_lea.vmem %s2365_s2, %s1714_s10 }
 0x161   : > { %1427 = vst [vmem:[%s1409_s26] sm:$0xff] %v1426_v31   ;;  %1431 = vst [vmem:[%s1409_s26 + $0x20] sm:$0xff] %v1430_v32  }
 0x162   : > { %1435 = vst [vmem:[%s1409_s26 + $0x40] sm:$0xff] %v1434_v33   ;;  %1439 = vst [vmem:[%s1409_s26 + $0x60] sm:$0xff] %v1438_v34  }
 0x163 PF: > { %s14_s20 = sadd.s32 1, %s2039_s20   ;;  %s2370_s12 = smov %s2011_s13 }
 0x164   : > { %p11_p3 = scmp.ge.s32.totalorder %s14_s20, 10   ;;  %s2371_s13 = smov %s2135_s7 }
 0x165   : > { %s2372_s14 = smov %s2027_s17  ;;  %s2373_s15 = smov %s2031_s18 }
 0x166   : > { %s2374_s16 = smov %s2035_s19  ;;  %s2375_s17 = smov %s2379_s21 }
 0x167   : > { %s2376_s18 = smov %s2383_s22  ;;  %s2377_s19 = smov %s2387_s25 }
 0x168   :  { %13 = sbr.rel (!%p11_p3) target bundleno = 7 (0x7), region = 191 }

</bundles_post_ra>
